<compile_context>
chip_gen: v7x
topology: tpu7x:2x2x1
jax: 0.10.0
libtpu: 0.0.40
codegen_flags: <defaults>
</compile_context>

<pallas_src>
from math import ceil

import jax
import jax.numpy as jnp
from jax.experimental import pallas as pl
from jax.experimental.pallas import tpu as pltpu

_LOG2 = 0.6931471805599453
LANE = 128  # padded feature width (lane dimension)


def _ssp(x):
    # shifted softplus: softplus(x) - log(2) = max(x,0) + log(1 + exp(-|x|)) - log(2)
    # (1 exp + 1 log on the EUP; numerically stable; ssp(0) == 0 up to 1 ulp)
    return jnp.maximum(x, 0.0) + jnp.log(1.0 + jnp.exp(-jnp.abs(x))) - _LOG2


def _round_up(n, m):
    return ((n + m - 1) // m) * m


def _pad2(a, rows, cols):
    out = jnp.zeros((rows, cols), jnp.float32)
    return out.at[: a.shape[0], : a.shape[1]].set(a.astype(jnp.float32))


def _choose_tile(n, requested, align=8):
    """Pick a row tile (multiple of `align` sublanes) and the padded extent.

    Prefers the requested tile, shrinks for small inputs, and keeps the grid at
    >= 2 steps whenever there is enough work so the "parallel" grid axis can be
    sharded across both v7x TensorCores."""
    n_al = _round_up(max(n, align), align)
    tile = min(_round_up(requested, align), n_al)
    if n_al // tile < 2 and n_al >= 2 * align:
        tile = max(align, _round_up(n_al // 2, align))
    n_pad = _round_up(n_al, tile)
    return tile, n_pad


# ----------------------------- Pallas kernels -----------------------------

def edge_message_kernel(xj_ref, ea_ref, wblk_ref, bd_ref, msg_ref):
    """Per-edge message with ONE fused 256-wide MXU pass.

    lhs  = [ssp(x[src]) | edge_attr_pad]                (tile_e, 256), bf16
    res  = lhs @ [[WdT, 0], [0, WgT]]                   (tile_e, 256), f32 acc
    msg  = (res[:, :128] + bd) * res[:, 128:]
    Weights are pre-transposed (in, out) -> no in-kernel transpose."""
    x_a = _ssp(xj_ref[...])                                  # f32 elementwise (v5e-safe)
    ea = ea_ref[...].astype(jnp.float32)                     # bf16 -> f32 (exact)
    lhs = jnp.concatenate([x_a, ea], axis=-1).astype(jnp.bfloat16)
    res = jnp.dot(lhs, wblk_ref[...], preferred_element_type=jnp.float32)
    diff = res[:, :LANE] + bd_ref[...]
    gate = res[:, LANE:]          # exactly 0 for zero-padded edge rows (G has no bias)
    msg_ref[...] = diff * gate


def make_node_chain_kernel(n_res_interaction, n_res_atomic, n_res_output, n_read_out):
    """Fused per-node chain. Layer counts are static -> unrolled at trace time."""

    def kernel(x_ref, aggr_ref, ws_ref, bs_ref, u_ref, wi_ref, bi_ref,
               rw1_ref, rb1_ref, rw2_ref, rb2_ref,
               ro_w_ref, ro_b_ref, lin_ref,
               tmp_res_ref, out_ref):

        def mm(act_f32, w):
            # bf16 operands, f32 accumulation on the MXU (fast on v5e/v6e/v7x);
            # all surrounding elementwise math stays f32.
            return jnp.dot(act_f32.astype(jnp.bfloat16), w,
                           preferred_element_type=jnp.float32)

        def residual(t, li):
            h = mm(_ssp(t), rw1_ref[li]) + rb1_ref[li]
            h = mm(_ssp(h), rw2_ref[li]) + rb2_ref[li]
            return t + h

        x = x_ref[...]
        # m = Linear_same(ssp(x)) + scatter-added messages
        m = mm(_ssp(x), ws_ref[...]) + bs_ref[...] + aggr_ref[...]

        li = 0
        t = m
        for _ in range(n_res_interaction):
            t = residual(t, li)
            li += 1

        # interaction finish: Linear_last(ssp(tmp)) + u * x
        t = mm(_ssp(t), wi_ref[...]) + bi_ref[...] + u_ref[...] * x

        for _ in range(n_res_atomic):
            t = residual(t, li)
            li += 1
        tmp_res_ref[...] = t

        out = t
        for _ in range(n_res_output):
            out = residual(out, li)
            li += 1
        for r in range(n_read_out):
            out = mm(_ssp(out), ro_w_ref[r]) + ro_b_ref[r]
        # final (zero-initialized) linear, no bias — folded in, lane-dense padded output
        out_ref[...] = mm(_ssp(out), lin_ref[...])

    return kernel


# ----------------------------- pallas_call glue -----------------------------

# Scoped VMEM limit: worst-case usage (tile 1024 rows) stays well under this, and
# 32 MiB is itself below v7x's 64 MiB per-TensorCore VMEM.
_VMEM_LIMIT = 32 * 1024 * 1024

# NOTE: the grid-invariant weight blocks below are double-buffered by default;
# single-buffering them (pipeline_mode=pl.Buffered(1)) would free ~1 MiB of VMEM,
# but is unnecessary at these sizes, so we keep the default for robustness.


def edge_message_call(x_src, ea_pad, w_edge, bd, tile_e):
    e_pad = x_src.shape[0]
    row = lambda i: (i, 0)
    inv2 = lambda i: (0, 0)
    return pl.pallas_call(
        edge_message_kernel,
        grid=(e_pad // tile_e,),
        in_specs=[pl.BlockSpec((tile_e, LANE), row),          # gathered x[src] tile (f32)
                  pl.BlockSpec((tile_e, LANE), row),          # edge_attr tile (bf16)
                  pl.BlockSpec((2 * LANE, 2 * LANE), inv2),   # block-diag [[WdT,0],[0,WgT]]
                  pl.BlockSpec((1, LANE), inv2)],             # bd
        out_specs=pl.BlockSpec((tile_e, LANE), row),
        out_shape=jax.ShapeDtypeStruct((e_pad, LANE), jnp.float32),
        compiler_params=pltpu.CompilerParams(
            dimension_semantics=("parallel",),
            vmem_limit_bytes=_VMEM_LIMIT),
    )(x_src, ea_pad, w_edge, bd)


def node_chain_call(kernel, n_pad, tile_n, x_pad, aggr, q):
    L = q['rw1'].shape[0]
    R = q['ro_w'].shape[0]
    inv2 = lambda i: (0, 0)
    inv3 = lambda i: (0, 0, 0)
    row = lambda i: (i, 0)
    in_specs = [
        pl.BlockSpec((tile_n, LANE), row),      # x tile
        pl.BlockSpec((tile_n, LANE), row),      # aggregated messages tile
        pl.BlockSpec((LANE, LANE), inv2),       # WsT        (grid-invariant -> resident)
        pl.BlockSpec((1, LANE), inv2),          # bs
        pl.BlockSpec((1, LANE), inv2),          # u
        pl.BlockSpec((LANE, LANE), inv2),       # W_int_last^T
        pl.BlockSpec((1, LANE), inv2),          # b_int_last
        pl.BlockSpec((L, LANE, LANE), inv3),    # stacked residual W1^T
        pl.BlockSpec((L, 1, LANE), inv3),       # stacked residual b1
        pl.BlockSpec((L, LANE, LANE), inv3),    # stacked residual W2^T
        pl.BlockSpec((L, 1, LANE), inv3),       # stacked residual b2
        pl.BlockSpec((R, LANE, LANE), inv3),    # stacked read_out W^T
        pl.BlockSpec((R, 1, LANE), inv3),       # stacked read_out b
        pl.BlockSpec((LANE, LANE), inv2),       # final lin W^T (zero-init)
    ]
    out_specs = (pl.BlockSpec((tile_n, LANE), row),
                 pl.BlockSpec((tile_n, LANE), row))
    out_shape = (jax.ShapeDtypeStruct((n_pad, LANE), jnp.float32),
                 jax.ShapeDtypeStruct((n_pad, LANE), jnp.float32))
    return pl.pallas_call(
        kernel,
        grid=(n_pad // tile_n,),
        in_specs=in_specs,
        out_specs=out_specs,
        out_shape=out_shape,
        compiler_params=pltpu.CompilerParams(
            dimension_semantics=("parallel",),
            vmem_limit_bytes=_VMEM_LIMIT),
    )(x_pad, aggr, q['wsT'], q['bs'], q['u'], q['wiT'], q['bi'],
      q['rw1'], q['rb1'], q['rw2'], q['rb2'], q['ro_w'], q['ro_b'], q['linT'])


# ----------------------------- parameter init -----------------------------

def _linear_init(key, out_f, in_f, bias=True):
    k1, k2 = jax.random.split(key)
    bound = 1.0 / (in_f ** 0.5)
    w = jax.random.uniform(k1, (out_f, in_f), jnp.float32, -bound, bound)
    b = jax.random.uniform(k2, (1, out_f), jnp.float32, -bound, bound) if bias else None
    return w, b


def init_params(key, F, K, n_output, n_res_interaction, n_res_atomic,
                n_res_output, n_read_out):
    keys = iter(jax.random.split(key, 64))
    p = {}
    # MessagePassingLayer
    p['mp_w_same'], p['mp_b_same'] = _linear_init(next(keys), F, F)
    p['mp_w_diff'], p['mp_b_diff'] = _linear_init(next(keys), F, F)
    p['mp_w_G'], _ = _linear_init(next(keys), F, K, bias=False)   # no bias (important!)

    def res_block():
        w1, b1 = _linear_init(next(keys), F, F)
        w2, b2 = _linear_init(next(keys), F, F)
        return (w1, b1, w2, b2)

    p['interaction_res'] = [res_block() for _ in range(n_res_interaction)]
    p['int_lin_w'], p['int_lin_b'] = _linear_init(next(keys), F, F)
    p['u'] = jnp.ones((1, F), jnp.float32)                 # gate, init to ones

    p['atomic_res'] = [res_block() for _ in range(n_res_atomic)]

    # _OutputLayer
    p['output_res'] = [res_block() for _ in range(n_res_output)]
    p['read_out'] = []
    last_dim = F
    for _ in range(n_read_out):
        this_dim = ceil(last_dim / 2)
        w, b = _linear_init(next(keys), this_dim, last_dim)
        p['read_out'].append((w, b))
        last_dim = this_dim
    p['lin_w'] = jnp.zeros((n_output, last_dim), jnp.float32)   # zero-initialized, no bias
    return p


def prepare_padded_params(p):
    """Pre-transpose weights to (in, out), zero-pad to 128 lanes, cast matmul weights
    to bf16, and stack per-layer weights so the fused kernel keeps them VMEM-resident."""
    def lin_t_pad(w):                      # PyTorch (out,in) -> padded (128,128) (in,out), bf16
        return _pad2(w.T, LANE, LANE).astype(jnp.bfloat16)

    def bias_pad(b):                       # biases stay f32 (added after f32 accumulation)
        return _pad2(b, 1, LANE)

    q = {}
    q['wsT'] = lin_t_pad(p['mp_w_same']); q['bs'] = bias_pad(p['mp_b_same'])

    # fused block-diagonal edge weight [[WdT, 0], [0, WgT]]  (256, 256) -> one MXU pass
    wd = _pad2(p['mp_w_diff'].T, LANE, LANE)
    wg = _pad2(p['mp_w_G'].T, LANE, LANE)
    w_edge = jnp.zeros((2 * LANE, 2 * LANE), jnp.float32)
    w_edge = w_edge.at[:LANE, :LANE].set(wd).at[LANE:, LANE:].set(wg)
    q['w_edge'] = w_edge.astype(jnp.bfloat16)
    q['bd'] = bias_pad(p['mp_b_diff'])

    q['u'] = bias_pad(p['u'])
    q['wiT'] = lin_t_pad(p['int_lin_w']); q['bi'] = bias_pad(p['int_lin_b'])

    res_all = p['interaction_res'] + p['atomic_res'] + p['output_res']
    if res_all:
        q['rw1'] = jnp.stack([lin_t_pad(w1) for (w1, _, _, _) in res_all])
        q['rb1'] = jnp.stack([bias_pad(b1) for (_, b1, _, _) in res_all])
        q['rw2'] = jnp.stack([lin_t_pad(w2) for (_, _, w2, _) in res_all])
        q['rb2'] = jnp.stack([bias_pad(b2) for (_, _, _, b2) in res_all])
    else:
        q['rw1'] = jnp.zeros((1, LANE, LANE), jnp.bfloat16)
        q['rb1'] = jnp.zeros((1, 1, LANE), jnp.float32)
        q['rw2'] = jnp.zeros((1, LANE, LANE), jnp.bfloat16)
        q['rb2'] = jnp.zeros((1, 1, LANE), jnp.float32)

    if p['read_out']:
        q['ro_w'] = jnp.stack([lin_t_pad(w) for (w, _) in p['read_out']])
        q['ro_b'] = jnp.stack([bias_pad(b) for (_, b) in p['read_out']])
    else:
        q['ro_w'] = jnp.zeros((1, LANE, LANE), jnp.bfloat16)
        q['ro_b'] = jnp.zeros((1, 1, LANE), jnp.float32)

    q['linT'] = _pad2(p['lin_w'].T, LANE, LANE).astype(jnp.bfloat16)
    return q


# ----------------------------- forward -----------------------------

def make_phys_forward(F, K, n_output, n_res_interaction, n_res_atomic,
                      n_res_output, n_read_out, tile_n=256, tile_e=512):
    node_kernel = make_node_chain_kernel(n_res_interaction, n_res_atomic,
                                         n_res_output, n_read_out)

    @jax.jit
    def forward(q, x, src, tgt, edge_attr):
        N = x.shape[0]
        E = edge_attr.shape[0]
        tile_nn, n_pad = _choose_tile(N, tile_n)
        tile_ee, e_pad = _choose_tile(E, tile_e)

        x_pad = jnp.zeros((n_pad, LANE), jnp.float32).at[:N, :F].set(
            x.astype(jnp.float32))
        # edge_attr travels as bf16 (halves its HBM read); padded rows stay exactly 0,
        # so the (bias-free) gate of padded edges is exactly 0 and their messages vanish.
        ea_pad = jnp.zeros((e_pad, LANE), jnp.bfloat16).at[:E, :K].set(
            edge_attr.astype(jnp.bfloat16))
        src_pad = jnp.zeros((e_pad,), jnp.int32).at[:E].set(src)
        tgt_pad = jnp.zeros((e_pad,), jnp.int32).at[:E].set(tgt)

        # O(E*F) index-based gather (XLA, same jit).
        x_src = jnp.take(x_pad, src_pad, axis=0)

        # per-edge messages (Pallas, edge-tile grid, fused 256-wide MXU pass)
        msg = edge_message_call(x_src, ea_pad, q['w_edge'], q['bd'], tile_ee)

        # O(E*F) scatter-add over target nodes (padded edges add exact zeros to node 0)
        aggr = jax.ops.segment_sum(msg, tgt_pad, num_segments=n_pad)

        # fused node chain (Pallas, node-tile grid, stacked bf16 weights resident)
        tmp_res_pad, out_pad = node_chain_call(node_kernel, n_pad, tile_nn,
                                               x_pad, aggr, q)
        tmp_res = tmp_res_pad[:N, :F]
        out_res = out_pad[:N, :n_output]
        regularization = jnp.float32(0.0)   # no concrete dropout / batch norm here
        return tmp_res, out_res, regularization

    return forward


# ----------------------------- pure-JAX reference -----------------------------

def reference_forward(p, x, src, tgt, edge_attr, mm_dtype=jnp.float32):
    """Reference of the same module. With mm_dtype=bf16 it emulates exactly the
    kernel's numerics (bf16 matmul operands, f32 accumulation, f32 elementwise)."""
    def mm(a, w):  # w in torch layout (out, in)
        return jnp.dot(a.astype(mm_dtype), w.T.astype(mm_dtype),
                       preferred_element_type=jnp.float32)

    def lin(v, w, b=None):
        y = mm(v, w)
        return y + b if b is not None else y

    def res(v, blk):
        w1, b1, w2, b2 = blk
        h = lin(_ssp(v), w1, b1)
        h = lin(_ssp(h), w2, b2)
        return v + h

    N, F_ = x.shape
    x_a = _ssp(x)
    gate = mm(edge_attr, p['mp_w_G'])
    msg = lin(x_a[src], p['mp_w_diff'], p['mp_b_diff']) * gate
    aggr = jnp.zeros((N, F_), jnp.float32).at[tgt].add(msg)
    t = lin(x_a, p['mp_w_same'], p['mp_b_same']) + aggr
    for blk in p['interaction_res']:
        t = res(t, blk)
    t = lin(_ssp(t), p['int_lin_w'], p['int_lin_b']) + p['u'] * x
    for blk in p['atomic_res']:
        t = res(t, blk)
    tmp_res = t
    out = t
    for blk in p['output_res']:
        out = res(out, blk)
    for (w, b) in p['read_out']:
        out = lin(_ssp(out), w, b)
    out = lin(_ssp(out), p['lin_w'])
    return tmp_res, out


# ----------------------------- main -----------------------------

if __name__ == "__main__":
    # module hyper-parameters
    F, K = 32, 16
    n_output = 2
    n_res_atomic, n_res_interaction, n_res_output = 2, 2, 1
    n_read_out = 2

    # small graph (tile chooser shrinks tiles, keeps >= 2 grid steps)
    N_nodes, N_edges = 24, 48

    key = jax.random.PRNGKey(0)
    k_x, k_ea, k_src, k_tgt, k_p = jax.random.split(key, 5)

    x = jax.random.normal(k_x, (N_nodes, F), jnp.float32)
    edge_attr = jax.random.normal(k_ea, (N_edges, K), jnp.float32)
    src = jax.random.randint(k_src, (N_edges,), 0, N_nodes, dtype=jnp.int32)  # edge_index[0]
    tgt = jax.random.randint(k_tgt, (N_edges,), 0, N_nodes, dtype=jnp.int32)  # edge_index[1]

    params = init_params(k_p, F, K, n_output, n_res_interaction,
                         n_res_atomic, n_res_output, n_read_out)
    padded = prepare_padded_params(params)

    forward = make_phys_forward(F, K, n_output, n_res_interaction, n_res_atomic,
                                n_res_output, n_read_out, tile_n=256, tile_e=512)

    tmp_res, out_res, reg = forward(padded, x, src, tgt, edge_attr)
    jax.block_until_ready((tmp_res, out_res))

    # shape / sanity checks
    assert tmp_res.shape == (N_nodes, F)
    assert out_res.shape == (N_nodes, n_output)
    assert bool(jnp.all(jnp.isfinite(tmp_res)))
    # final lin is zero-initialized in the PyTorch module, so out_res must be exactly zero
    assert bool(jnp.all(out_res == 0.0))
    assert float(reg) == 0.0

    # (A) structural check: reference that emulates the kernel's bf16 matmul operands
    #     (catches any indexing / padding / layer-order bug; expected error ~1e-3)
    ref_tmp_b, ref_out_b = reference_forward(params, x, src, tgt, edge_attr,
                                             mm_dtype=jnp.bfloat16)
    err_struct = float(jnp.max(jnp.abs(tmp_res - ref_tmp_b)))
    assert err_struct < 3e-2, f"tmp_res mismatch vs bf16-matmul reference: {err_struct}"
    assert float(jnp.max(jnp.abs(out_res - ref_out_b))) == 0.0

    # (B) numerics sanity vs a full-f32 reference (bf16 matmul error budget)
    ref_tmp_f, _ = reference_forward(params, x, src, tgt, edge_attr,
                                     mm_dtype=jnp.float32)
    rel = float(jnp.max(jnp.abs(tmp_res - ref_tmp_f)
                        / jnp.maximum(jnp.abs(ref_tmp_f), 1.0)))
    assert rel < 1e-1, f"tmp_res drift vs f32 reference too large: {rel}"

    print("KERNEL_OK")
</pallas_src>

<mosaic_0001>
module attributes {stable_mosaic.version = 11 : i64} {
  func.func @edge_message_kernel(%arg0: i32, %arg1: memref<24x128xf32, #tpu.memory_space<vmem>>, %arg2: memref<24x128xbf16, #tpu.memory_space<vmem>>, %arg3: memref<256x256xbf16, #tpu.memory_space<vmem>>, %arg4: memref<1x128xf32, #tpu.memory_space<vmem>>, %arg5: memref<24x128xf32, #tpu.memory_space<vmem>>) attributes {dimension_semantics = [#tpu.dimension_semantics<parallel>], iteration_bounds = array<i64: 2>, scalar_prefetch = 0 : i64, scratch_operands = 0 : i64, tpu.core_type = #tpu.core_type<tc>, window_params = [{transform_indices = @transform_0, window_bounds = array<i64: 24, 128>}, {transform_indices = @transform_1, window_bounds = array<i64: 24, 128>}, {pipeline_mode = #tpu.pipeline_mode<synchronous>, transform_indices = @transform_2, window_bounds = array<i64: 256, 256>}, {pipeline_mode = #tpu.pipeline_mode<synchronous>, transform_indices = @transform_3, window_bounds = array<i64: 1, 128>}, {transform_indices = @transform_4, window_bounds = array<i64: 24, 128>}]} {
    %c0 = arith.constant 0 : index
    %c0_0 = arith.constant 0 : index
    %0 = vector.load %arg1[%c0, %c0_0] : memref<24x128xf32, #tpu.memory_space<vmem>>, vector<24x128xf32>
    %cst = arith.constant 0.000000e+00 : f32
    %1 = vector.broadcast %cst : f32 to vector<24x128xf32>
    %2 = arith.maximumf %0, %1 : vector<24x128xf32>
    %3 = math.absf %0 : vector<24x128xf32>
    %cst_1 = arith.constant 0.000000e+00 : f32
    %4 = vector.broadcast %cst_1 : f32 to vector<24x128xf32>
    %5 = arith.subf %4, %3 : vector<24x128xf32>
    %6 = math.exp %5 : vector<24x128xf32>
    %cst_2 = arith.constant 1.000000e+00 : f32
    %7 = vector.broadcast %cst_2 : f32 to vector<24x128xf32>
    %8 = arith.addf %7, %6 : vector<24x128xf32>
    %9 = math.log %8 : vector<24x128xf32>
    %10 = arith.addf %2, %9 : vector<24x128xf32>
    %cst_3 = arith.constant 0.693147182 : f32
    %11 = vector.broadcast %cst_3 : f32 to vector<24x128xf32>
    %12 = arith.subf %10, %11 : vector<24x128xf32>
    %c0_4 = arith.constant 0 : index
    %c0_5 = arith.constant 0 : index
    %13 = vector.load %arg2[%c0_4, %c0_5] : memref<24x128xbf16, #tpu.memory_space<vmem>>, vector<24x128xbf16>
    %14 = arith.extf %13 : vector<24x128xbf16> to vector<24x128xf32>
    %15 = tpu.concatenate %12, %14 in 1 : vector<24x128xf32>, vector<24x128xf32> -> vector<24x256xf32>
    %16 = arith.truncf %15 : vector<24x256xf32> to vector<24x256xbf16>
    %c0_6 = arith.constant 0 : index
    %c0_7 = arith.constant 0 : index
    %17 = vector.load %arg3[%c0_6, %c0_7] : memref<256x256xbf16, #tpu.memory_space<vmem>>, vector<256x256xbf16>
    %cst_8 = arith.constant dense<0.000000e+00> : vector<24x256xf32>
    %18 = tpu.matmul %16, %17, %cst_8 {dimension_numbers = #tpu.dot_dimension_numbers<[1], [0], [0], [1], [0, 0, 1, 1], [], []>} : vector<24x256xbf16>, vector<256x256xbf16>, vector<24x256xf32> -> vector<24x256xf32>
    %19 = vector.extract_strided_slice %18 {offsets = [0, 0], sizes = [24, 128], strides = [1, 1]} : vector<24x256xf32> to vector<24x128xf32>
    %c0_9 = arith.constant 0 : index
    %c0_10 = arith.constant 0 : index
    %20 = vector.load %arg4[%c0_9, %c0_10] : memref<1x128xf32, #tpu.memory_space<vmem>>, vector<1x128xf32>
    %21 = vector.broadcast %20 : vector<1x128xf32> to vector<24x128xf32>
    %22 = arith.addf %19, %21 : vector<24x128xf32>
    %23 = vector.extract_strided_slice %18 {offsets = [0, 128], sizes = [24, 128], strides = [1, 1]} : vector<24x256xf32> to vector<24x128xf32>
    %24 = arith.mulf %22, %23 : vector<24x128xf32>
    %c0_11 = arith.constant 0 : index
    %c0_12 = arith.constant 0 : index
    %25 = vector.load %arg5[%c0_11, %c0_12] : memref<24x128xf32, #tpu.memory_space<vmem>>, vector<24x128xf32>
    tpu.vector_store %arg5[%c0_11, %c0_12], %24 {strides = array<i32>} : memref<24x128xf32, #tpu.memory_space<vmem>>, vector<24x128xf32>,
    return
  }
  func.func @transform_0(%arg0: i32) -> (i32, i32) {
    %c0_i32 = arith.constant 0 : i32
    %c0_i32_0 = arith.constant 0 : i32
    return %arg0, %c0_i32 : i32, i32
  }
  func.func @transform_1(%arg0: i32) -> (i32, i32) {
    %c0_i32 = arith.constant 0 : i32
    %c0_i32_0 = arith.constant 0 : i32
    return %arg0, %c0_i32 : i32, i32
  }
  func.func @transform_2(%arg0: i32) -> (i32, i32) {
    %c0_i32 = arith.constant 0 : i32
    %c0_i32_0 = arith.constant 0 : i32
    %c0_i32_1 = arith.constant 0 : i32
    return %c0_i32, %c0_i32_0 : i32, i32
  }
  func.func @transform_3(%arg0: i32) -> (i32, i32) {
    %c0_i32 = arith.constant 0 : i32
    %c0_i32_0 = arith.constant 0 : i32
    %c0_i32_1 = arith.constant 0 : i32
    return %c0_i32, %c0_i32_0 : i32, i32
  }
  func.func @transform_4(%arg0: i32) -> (i32, i32) {
    %c0_i32 = arith.constant 0 : i32
    %c0_i32_0 = arith.constant 0 : i32
    return %arg0, %c0_i32 : i32, i32
  }
}

module attributes {stable_mosaic.version = 11 : i64} {
  func.func @kernel(%arg0: i32, %arg1: memref<16x128xf32, #tpu.memory_space<vmem>>, %arg2: memref<16x128xf32, #tpu.memory_space<vmem>>, %arg3: memref<128x128xbf16, #tpu.memory_space<vmem>>, %arg4: memref<1x128xf32, #tpu.memory_space<vmem>>, %arg5: memref<1x128xf32, #tpu.memory_space<vmem>>, %arg6: memref<128x128xbf16, #tpu.memory_space<vmem>>, %arg7: memref<1x128xf32, #tpu.memory_space<vmem>>, %arg8: memref<5x128x128xbf16, #tpu.memory_space<vmem>>, %arg9: memref<5x1x128xf32, #tpu.memory_space<vmem>>, %arg10: memref<5x128x128xbf16, #tpu.memory_space<vmem>>, %arg11: memref<5x1x128xf32, #tpu.memory_space<vmem>>, %arg12: memref<2x128x128xbf16, #tpu.memory_space<vmem>>, %arg13: memref<2x1x128xf32, #tpu.memory_space<vmem>>, %arg14: memref<128x128xbf16, #tpu.memory_space<vmem>>, %arg15: memref<16x128xf32, #tpu.memory_space<vmem>>, %arg16: memref<16x128xf32, #tpu.memory_space<vmem>>) attributes {dimension_semantics = [#tpu.dimension_semantics<parallel>], iteration_bounds = array<i64: 2>, scalar_prefetch = 0 : i64, scratch_operands = 0 : i64, tpu.core_type = #tpu.core_type<tc>, window_params = [{transform_indices = @transform_0, window_bounds = array<i64: 16, 128>}, {transform_indices = @transform_1, window_bounds = array<i64: 16, 128>}, {pipeline_mode = #tpu.pipeline_mode<synchronous>, transform_indices = @transform_2, window_bounds = array<i64: 128, 128>}, {pipeline_mode = #tpu.pipeline_mode<synchronous>, transform_indices = @transform_3, window_bounds = array<i64: 1, 128>}, {pipeline_mode = #tpu.pipeline_mode<synchronous>, transform_indices = @transform_4, window_bounds = array<i64: 1, 128>}, {pipeline_mode = #tpu.pipeline_mode<synchronous>, transform_indices = @transform_5, window_bounds = array<i64: 128, 128>}, {pipeline_mode = #tpu.pipeline_mode<synchronous>, transform_indices = @transform_6, window_bounds = array<i64: 1, 128>}, {pipeline_mode = #tpu.pipeline_mode<synchronous>, transform_indices = @transform_7, window_bounds = array<i64: 5, 128, 128>}, {pipeline_mode = #tpu.pipeline_mode<synchronous>, transform_indices = @transform_8, window_bounds = array<i64: 5, 1, 128>}, {pipeline_mode = #tpu.pipeline_mode<synchronous>, transform_indices = @transform_9, window_bounds = array<i64: 5, 128, 128>}, {pipeline_mode = #tpu.pipeline_mode<synchronous>, transform_indices = @transform_10, window_bounds = array<i64: 5, 1, 128>}, {pipeline_mode = #tpu.pipeline_mode<synchronous>, transform_indices = @transform_11, window_bounds = array<i64: 2, 128, 128>}, {pipeline_mode = #tpu.pipeline_mode<synchronous>, transform_indices = @transform_12, window_bounds = array<i64: 2, 1, 128>}, {pipeline_mode = #tpu.pipeline_mode<synchronous>, transform_indices = @transform_13, window_bounds = array<i64: 128, 128>}, {transform_indices = @transform_14, window_bounds = array<i64: 16, 128>}, {transform_indices = @transform_15, window_bounds = array<i64: 16, 128>}]} {
    %c0 = arith.constant 0 : index
    %c0_0 = arith.constant 0 : index
    %0 = vector.load %arg1[%c0, %c0_0] : memref<16x128xf32, #tpu.memory_space<vmem>>, vector<16x128xf32>
    %cst = arith.constant 0.000000e+00 : f32
    %1 = vector.broadcast %cst : f32 to vector<16x128xf32>
    %2 = arith.maximumf %0, %1 : vector<16x128xf32>
    %3 = math.absf %0 : vector<16x128xf32>
    %cst_1 = arith.constant 0.000000e+00 : f32
    %4 = vector.broadcast %cst_1 : f32 to vector<16x128xf32>
    %5 = arith.subf %4, %3 : vector<16x128xf32>
    %6 = math.exp %5 : vector<16x128xf32>
    %cst_2 = arith.constant 1.000000e+00 : f32
    %7 = vector.broadcast %cst_2 : f32 to vector<16x128xf32>
    %8 = arith.addf %7, %6 : vector<16x128xf32>
    %9 = math.log %8 : vector<16x128xf32>
    %10 = arith.addf %2, %9 : vector<16x128xf32>
    %cst_3 = arith.constant 0.693147182 : f32
    %11 = vector.broadcast %cst_3 : f32 to vector<16x128xf32>
    %12 = arith.subf %10, %11 : vector<16x128xf32>
    %c0_4 = arith.constant 0 : index
    %c0_5 = arith.constant 0 : index
    %13 = vector.load %arg3[%c0_4, %c0_5] : memref<128x128xbf16, #tpu.memory_space<vmem>>, vector<128x128xbf16>
    %14 = arith.truncf %12 : vector<16x128xf32> to vector<16x128xbf16>
    %cst_6 = arith.constant dense<0.000000e+00> : vector<16x128xf32>
    %15 = tpu.matmul %14, %13, %cst_6 {dimension_numbers = #tpu.dot_dimension_numbers<[1], [0], [0], [1], [0, 0, 1, 1], [], []>} : vector<16x128xbf16>, vector<128x128xbf16>, vector<16x128xf32> -> vector<16x128xf32>
    %c0_7 = arith.constant 0 : index
    %c0_8 = arith.constant 0 : index
    %16 = vector.load %arg4[%c0_7, %c0_8] : memref<1x128xf32, #tpu.memory_space<vmem>>, vector<1x128xf32>
    %17 = vector.broadcast %16 : vector<1x128xf32> to vector<16x128xf32>
    %18 = arith.addf %15, %17 : vector<16x128xf32>
    %c0_9 = arith.constant 0 : index
    %c0_10 = arith.constant 0 : index
    %19 = vector.load %arg2[%c0_9, %c0_10] : memref<16x128xf32, #tpu.memory_space<vmem>>, vector<16x128xf32>
    %20 = arith.addf %18, %19 : vector<16x128xf32>
    %cst_11 = arith.constant 0.000000e+00 : f32
    %21 = vector.broadcast %cst_11 : f32 to vector<16x128xf32>
    %22 = arith.maximumf %20, %21 : vector<16x128xf32>
    %23 = math.absf %20 : vector<16x128xf32>
    %cst_12 = arith.constant 0.000000e+00 : f32
    %24 = vector.broadcast %cst_12 : f32 to vector<16x128xf32>
    %25 = arith.subf %24, %23 : vector<16x128xf32>
    %26 = math.exp %25 : vector<16x128xf32>
    %cst_13 = arith.constant 1.000000e+00 : f32
    %27 = vector.broadcast %cst_13 : f32 to vector<16x128xf32>
    %28 = arith.addf %27, %26 : vector<16x128xf32>
    %29 = math.log %28 : vector<16x128xf32>
    %30 = arith.addf %22, %29 : vector<16x128xf32>
    %cst_14 = arith.constant 0.693147182 : f32
    %31 = vector.broadcast %cst_14 : f32 to vector<16x128xf32>
    %32 = arith.subf %30, %31 : vector<16x128xf32>
    %c0_15 = arith.constant 0 : index
    %c0_16 = arith.constant 0 : index
    %c0_17 = arith.constant 0 : index
    %33 = vector.load %arg8[%c0_15, %c0_16, %c0_17] : memref<5x128x128xbf16, #tpu.memory_space<vmem>>, vector<1x128x128xbf16>
    %34 = vector.shape_cast %33 : vector<1x128x128xbf16> to vector<128x128xbf16>
    %35 = arith.truncf %32 : vector<16x128xf32> to vector<16x128xbf16>
    %cst_18 = arith.constant dense<0.000000e+00> : vector<16x128xf32>
    %36 = tpu.matmul %35, %34, %cst_18 {dimension_numbers = #tpu.dot_dimension_numbers<[1], [0], [0], [1], [0, 0, 1, 1], [], []>} : vector<16x128xbf16>, vector<128x128xbf16>, vector<16x128xf32> -> vector<16x128xf32>
    %c0_19 = arith.constant 0 : index
    %c0_20 = arith.constant 0 : index
    %c0_21 = arith.constant 0 : index
    %37 = vector.load %arg9[%c0_19, %c0_20, %c0_21] : memref<5x1x128xf32, #tpu.memory_space<vmem>>, vector<1x1x128xf32>
    %38 = vector.shape_cast %37 : vector<1x1x128xf32> to vector<1x128xf32>
    %39 = vector.broadcast %38 : vector<1x128xf32> to vector<16x128xf32>
    %40 = arith.addf %36, %39 : vector<16x128xf32>
    %cst_22 = arith.constant 0.000000e+00 : f32
    %41 = vector.broadcast %cst_22 : f32 to vector<16x128xf32>
    %42 = arith.maximumf %40, %41 : vector<16x128xf32>
    %43 = math.absf %40 : vector<16x128xf32>
    %cst_23 = arith.constant 0.000000e+00 : f32
    %44 = vector.broadcast %cst_23 : f32 to vector<16x128xf32>
    %45 = arith.subf %44, %43 : vector<16x128xf32>
    %46 = math.exp %45 : vector<16x128xf32>
    %cst_24 = arith.constant 1.000000e+00 : f32
    %47 = vector.broadcast %cst_24 : f32 to vector<16x128xf32>
    %48 = arith.addf %47, %46 : vector<16x128xf32>
    %49 = math.log %48 : vector<16x128xf32>
    %50 = arith.addf %42, %49 : vector<16x128xf32>
    %cst_25 = arith.constant 0.693147182 : f32
    %51 = vector.broadcast %cst_25 : f32 to vector<16x128xf32>
    %52 = arith.subf %50, %51 : vector<16x128xf32>
    %c0_26 = arith.constant 0 : index
    %c0_27 = arith.constant 0 : index
    %c0_28 = arith.constant 0 : index
    %53 = vector.load %arg10[%c0_26, %c0_27, %c0_28] : memref<5x128x128xbf16, #tpu.memory_space<vmem>>, vector<1x128x128xbf16>
    %54 = vector.shape_cast %53 : vector<1x128x128xbf16> to vector<128x128xbf16>
    %55 = arith.truncf %52 : vector<16x128xf32> to vector<16x128xbf16>
    %cst_29 = arith.constant dense<0.000000e+00> : vector<16x128xf32>
    %56 = tpu.matmul %55, %54, %cst_29 {dimension_numbers = #tpu.dot_dimension_numbers<[1], [0], [0], [1], [0, 0, 1, 1], [], []>} : vector<16x128xbf16>, vector<128x128xbf16>, vector<16x128xf32> -> vector<16x128xf32>
    %c0_30 = arith.constant 0 : index
    %c0_31 = arith.constant 0 : index
    %c0_32 = arith.constant 0 : index
    %57 = vector.load %arg11[%c0_30, %c0_31, %c0_32] : memref<5x1x128xf32, #tpu.memory_space<vmem>>, vector<1x1x128xf32>
    %58 = vector.shape_cast %57 : vector<1x1x128xf32> to vector<1x128xf32>
    %59 = vector.broadcast %58 : vector<1x128xf32> to vector<16x128xf32>
    %60 = arith.addf %56, %59 : vector<16x128xf32>
    %61 = arith.addf %20, %60 : vector<16x128xf32>
    %cst_33 = arith.constant 0.000000e+00 : f32
    %62 = vector.broadcast %cst_33 : f32 to vector<16x128xf32>
    %63 = arith.maximumf %61, %62 : vector<16x128xf32>
    %64 = math.absf %61 : vector<16x128xf32>
    %cst_34 = arith.constant 0.000000e+00 : f32
    %65 = vector.broadcast %cst_34 : f32 to vector<16x128xf32>
    %66 = arith.subf %65, %64 : vector<16x128xf32>
    %67 = math.exp %66 : vector<16x128xf32>
    %cst_35 = arith.constant 1.000000e+00 : f32
    %68 = vector.broadcast %cst_35 : f32 to vector<16x128xf32>
    %69 = arith.addf %68, %67 : vector<16x128xf32>
    %70 = math.log %69 : vector<16x128xf32>
    %71 = arith.addf %63, %70 : vector<16x128xf32>
    %cst_36 = arith.constant 0.693147182 : f32
    %72 = vector.broadcast %cst_36 : f32 to vector<16x128xf32>
    %73 = arith.subf %71, %72 : vector<16x128xf32>
    %c1 = arith.constant 1 : index
    %c0_37 = arith.constant 0 : index
    %c0_38 = arith.constant 0 : index
    %74 = vector.load %arg8[%c1, %c0_37, %c0_38] : memref<5x128x128xbf16, #tpu.memory_space<vmem>>, vector<1x128x128xbf16>
    %75 = vector.shape_cast %74 : vector<1x128x128xbf16> to vector<128x128xbf16>
    %76 = arith.truncf %73 : vector<16x128xf32> to vector<16x128xbf16>
    %cst_39 = arith.constant dense<0.000000e+00> : vector<16x128xf32>
    %77 = tpu.matmul %76, %75, %cst_39 {dimension_numbers = #tpu.dot_dimension_numbers<[1], [0], [0], [1], [0, 0, 1, 1], [], []>} : vector<16x128xbf16>, vector<128x128xbf16>, vector<16x128xf32> -> vector<16x128xf32>
    %c1_40 = arith.constant 1 : index
    %c0_41 = arith.constant 0 : index
    %c0_42 = arith.constant 0 : index
    %78 = vector.load %arg9[%c1_40, %c0_41, %c0_42] : memref<5x1x128xf32, #tpu.memory_space<vmem>>, vector<1x1x128xf32>
    %79 = vector.shape_cast %78 : vector<1x1x128xf32> to vector<1x128xf32>
    %80 = vector.broadcast %79 : vector<1x128xf32> to vector<16x128xf32>
    %81 = arith.addf %77, %80 : vector<16x128xf32>
    %cst_43 = arith.constant 0.000000e+00 : f32
    %82 = vector.broadcast %cst_43 : f32 to vector<16x128xf32>
    %83 = arith.maximumf %81, %82 : vector<16x128xf32>
    %84 = math.absf %81 : vector<16x128xf32>
    %cst_44 = arith.constant 0.000000e+00 : f32
    %85 = vector.broadcast %cst_44 : f32 to vector<16x128xf32>
    %86 = arith.subf %85, %84 : vector<16x128xf32>
    %87 = math.exp %86 : vector<16x128xf32>
    %cst_45 = arith.constant 1.000000e+00 : f32
    %88 = vector.broadcast %cst_45 : f32 to vector<16x128xf32>
    %89 = arith.addf %88, %87 : vector<16x128xf32>
    %90 = math.log %89 : vector<16x128xf32>
    %91 = arith.addf %83, %90 : vector<16x128xf32>
    %cst_46 = arith.constant 0.693147182 : f32
    %92 = vector.broadcast %cst_46 : f32 to vector<16x128xf32>
    %93 = arith.subf %91, %92 : vector<16x128xf32>
    %c1_47 = arith.constant 1 : index
    %c0_48 = arith.constant 0 : index
    %c0_49 = arith.constant 0 : index
    %94 = vector.load %arg10[%c1_47, %c0_48, %c0_49] : memref<5x128x128xbf16, #tpu.memory_space<vmem>>, vector<1x128x128xbf16>
    %95 = vector.shape_cast %94 : vector<1x128x128xbf16> to vector<128x128xbf16>
    %96 = arith.truncf %93 : vector<16x128xf32> to vector<16x128xbf16>
    %cst_50 = arith.constant dense<0.000000e+00> : vector<16x128xf32>
    %97 = tpu.matmul %96, %95, %cst_50 {dimension_numbers = #tpu.dot_dimension_numbers<[1], [0], [0], [1], [0, 0, 1, 1], [], []>} : vector<16x128xbf16>, vector<128x128xbf16>, vector<16x128xf32> -> vector<16x128xf32>
    %c1_51 = arith.constant 1 : index
    %c0_52 = arith.constant 0 : index
    %c0_53 = arith.constant 0 : index
    %98 = vector.load %arg11[%c1_51, %c0_52, %c0_53] : memref<5x1x128xf32, #tpu.memory_space<vmem>>, vector<1x1x128xf32>
    %99 = vector.shape_cast %98 : vector<1x1x128xf32> to vector<1x128xf32>
    %100 = vector.broadcast %99 : vector<1x128xf32> to vector<16x128xf32>
    %101 = arith.addf %97, %100 : vector<16x128xf32>
    %102 = arith.addf %61, %101 : vector<16x128xf32>
    %cst_54 = arith.constant 0.000000e+00 : f32
    %103 = vector.broadcast %cst_54 : f32 to vector<16x128xf32>
    %104 = arith.maximumf %102, %103 : vector<16x128xf32>
    %105 = math.absf %102 : vector<16x128xf32>
    %cst_55 = arith.constant 0.000000e+00 : f32
    %106 = vector.broadcast %cst_55 : f32 to vector<16x128xf32>
    %107 = arith.subf %106, %105 : vector<16x128xf32>
    %108 = math.exp %107 : vector<16x128xf32>
    %cst_56 = arith.constant 1.000000e+00 : f32
    %109 = vector.broadcast %cst_56 : f32 to vector<16x128xf32>
    %110 = arith.addf %109, %108 : vector<16x128xf32>
    %111 = math.log %110 : vector<16x128xf32>
    %112 = arith.addf %104, %111 : vector<16x128xf32>
    %cst_57 = arith.constant 0.693147182 : f32
    %113 = vector.broadcast %cst_57 : f32 to vector<16x128xf32>
    %114 = arith.subf %112, %113 : vector<16x128xf32>
    %c0_58 = arith.constant 0 : index
    %c0_59 = arith.constant 0 : index
    %115 = vector.load %arg6[%c0_58, %c0_59] : memref<128x128xbf16, #tpu.memory_space<vmem>>, vector<128x128xbf16>
    %116 = arith.truncf %114 : vector<16x128xf32> to vector<16x128xbf16>
    %cst_60 = arith.constant dense<0.000000e+00> : vector<16x128xf32>
    %117 = tpu.matmul %116, %115, %cst_60 {dimension_numbers = #tpu.dot_dimension_numbers<[1], [0], [0], [1], [0, 0, 1, 1], [], []>} : vector<16x128xbf16>, vector<128x128xbf16>, vector<16x128xf32> -> vector<16x128xf32>
    %c0_61 = arith.constant 0 : index
    %c0_62 = arith.constant 0 : index
    %118 = vector.load %arg7[%c0_61, %c0_62] : memref<1x128xf32, #tpu.memory_space<vmem>>, vector<1x128xf32>
    %119 = vector.broadcast %118 : vector<1x128xf32> to vector<16x128xf32>
    %120 = arith.addf %117, %119 : vector<16x128xf32>
    %c0_63 = arith.constant 0 : index
    %c0_64 = arith.constant 0 : index
    %121 = vector.load %arg5[%c0_63, %c0_64] : memref<1x128xf32, #tpu.memory_space<vmem>>, vector<1x128xf32>
    %122 = vector.broadcast %121 : vector<1x128xf32> to vector<16x128xf32>
    %123 = arith.mulf %122, %0 : vector<16x128xf32>
    %124 = arith.addf %120, %123 : vector<16x128xf32>
    %cst_65 = arith.constant 0.000000e+00 : f32
    %125 = vector.broadcast %cst_65 : f32 to vector<16x128xf32>
    %126 = arith.maximumf %124, %125 : vector<16x128xf32>
    %127 = math.absf %124 : vector<16x128xf32>
    %cst_66 = arith.constant 0.000000e+00 : f32
    %128 = vector.broadcast %cst_66 : f32 to vector<16x128xf32>
    %129 = arith.subf %128, %127 : vector<16x128xf32>
    %130 = math.exp %129 : vector<16x128xf32>
    %cst_67 = arith.constant 1.000000e+00 : f32
    %131 = vector.broadcast %cst_67 : f32 to vector<16x128xf32>
    %132 = arith.addf %131, %130 : vector<16x128xf32>
    %133 = math.log %132 : vector<16x128xf32>
    %134 = arith.addf %126, %133 : vector<16x128xf32>
    %cst_68 = arith.constant 0.693147182 : f32
    %135 = vector.broadcast %cst_68 : f32 to vector<16x128xf32>
    %136 = arith.subf %134, %135 : vector<16x128xf32>
    %c2 = arith.constant 2 : index
    %c0_69 = arith.constant 0 : index
    %c0_70 = arith.constant 0 : index
    %137 = vector.load %arg8[%c2, %c0_69, %c0_70] : memref<5x128x128xbf16, #tpu.memory_space<vmem>>, vector<1x128x128xbf16>
    %138 = vector.shape_cast %137 : vector<1x128x128xbf16> to vector<128x128xbf16>
    %139 = arith.truncf %136 : vector<16x128xf32> to vector<16x128xbf16>
    %cst_71 = arith.constant dense<0.000000e+00> : vector<16x128xf32>
    %140 = tpu.matmul %139, %138, %cst_71 {dimension_numbers = #tpu.dot_dimension_numbers<[1], [0], [0], [1], [0, 0, 1, 1], [], []>} : vector<16x128xbf16>, vector<128x128xbf16>, vector<16x128xf32> -> vector<16x128xf32>
    %c2_72 = arith.constant 2 : index
    %c0_73 = arith.constant 0 : index
    %c0_74 = arith.constant 0 : index
    %141 = vector.load %arg9[%c2_72, %c0_73, %c0_74] : memref<5x1x128xf32, #tpu.memory_space<vmem>>, vector<1x1x128xf32>
    %142 = vector.shape_cast %141 : vector<1x1x128xf32> to vector<1x128xf32>
    %143 = vector.broadcast %142 : vector<1x128xf32> to vector<16x128xf32>
    %144 = arith.addf %140, %143 : vector<16x128xf32>
    %cst_75 = arith.constant 0.000000e+00 : f32
    %145 = vector.broadcast %cst_75 : f32 to vector<16x128xf32>
    %146 = arith.maximumf %144, %145 : vector<16x128xf32>
    %147 = math.absf %144 : vector<16x128xf32>
    %cst_76 = arith.constant 0.000000e+00 : f32
    %148 = vector.broadcast %cst_76 : f32 to vector<16x128xf32>
    %149 = arith.subf %148, %147 : vector<16x128xf32>
    %150 = math.exp %149 : vector<16x128xf32>
    %cst_77 = arith.constant 1.000000e+00 : f32
    %151 = vector.broadcast %cst_77 : f32 to vector<16x128xf32>
    %152 = arith.addf %151, %150 : vector<16x128xf32>
    %153 = math.log %152 : vector<16x128xf32>
    %154 = arith.addf %146, %153 : vector<16x128xf32>
    %cst_78 = arith.constant 0.693147182 : f32
    %155 = vector.broadcast %cst_78 : f32 to vector<16x128xf32>
    %156 = arith.subf %154, %155 : vector<16x128xf32>
    %c2_79 = arith.constant 2 : index
    %c0_80 = arith.constant 0 : index
    %c0_81 = arith.constant 0 : index
    %157 = vector.load %arg10[%c2_79, %c0_80, %c0_81] : memref<5x128x128xbf16, #tpu.memory_space<vmem>>, vector<1x128x128xbf16>
    %158 = vector.shape_cast %157 : vector<1x128x128xbf16> to vector<128x128xbf16>
    %159 = arith.truncf %156 : vector<16x128xf32> to vector<16x128xbf16>
    %cst_82 = arith.constant dense<0.000000e+00> : vector<16x128xf32>
    %160 = tpu.matmul %159, %158, %cst_82 {dimension_numbers = #tpu.dot_dimension_numbers<[1], [0], [0], [1], [0, 0, 1, 1], [], []>} : vector<16x128xbf16>, vector<128x128xbf16>, vector<16x128xf32> -> vector<16x128xf32>
    %c2_83 = arith.constant 2 : index
    %c0_84 = arith.constant 0 : index
    %c0_85 = arith.constant 0 : index
    %161 = vector.load %arg11[%c2_83, %c0_84, %c0_85] : memref<5x1x128xf32, #tpu.memory_space<vmem>>, vector<1x1x128xf32>
    %162 = vector.shape_cast %161 : vector<1x1x128xf32> to vector<1x128xf32>
    %163 = vector.broadcast %162 : vector<1x128xf32> to vector<16x128xf32>
    %164 = arith.addf %160, %163 : vector<16x128xf32>
    %165 = arith.addf %124, %164 : vector<16x128xf32>
    %cst_86 = arith.constant 0.000000e+00 : f32
    %166 = vector.broadcast %cst_86 : f32 to vector<16x128xf32>
    %167 = arith.maximumf %165, %166 : vector<16x128xf32>
    %168 = math.absf %165 : vector<16x128xf32>
    %cst_87 = arith.constant 0.000000e+00 : f32
    %169 = vector.broadcast %cst_87 : f32 to vector<16x128xf32>
    %170 = arith.subf %169, %168 : vector<16x128xf32>
    %171 = math.exp %170 : vector<16x128xf32>
    %cst_88 = arith.constant 1.000000e+00 : f32
    %172 = vector.broadcast %cst_88 : f32 to vector<16x128xf32>
    %173 = arith.addf %172, %171 : vector<16x128xf32>
    %174 = math.log %173 : vector<16x128xf32>
    %175 = arith.addf %167, %174 : vector<16x128xf32>
    %cst_89 = arith.constant 0.693147182 : f32
    %176 = vector.broadcast %cst_89 : f32 to vector<16x128xf32>
    %177 = arith.subf %175, %176 : vector<16x128xf32>
    %c3 = arith.constant 3 : index
    %c0_90 = arith.constant 0 : index
    %c0_91 = arith.constant 0 : index
    %178 = vector.load %arg8[%c3, %c0_90, %c0_91] : memref<5x128x128xbf16, #tpu.memory_space<vmem>>, vector<1x128x128xbf16>
    %179 = vector.shape_cast %178 : vector<1x128x128xbf16> to vector<128x128xbf16>
    %180 = arith.truncf %177 : vector<16x128xf32> to vector<16x128xbf16>
    %cst_92 = arith.constant dense<0.000000e+00> : vector<16x128xf32>
    %181 = tpu.matmul %180, %179, %cst_92 {dimension_numbers = #tpu.dot_dimension_numbers<[1], [0], [0], [1], [0, 0, 1, 1], [], []>} : vector<16x128xbf16>, vector<128x128xbf16>, vector<16x128xf32> -> vector<16x128xf32>
    %c3_93 = arith.constant 3 : index
    %c0_94 = arith.constant 0 : index
    %c0_95 = arith.constant 0 : index
    %182 = vector.load %arg9[%c3_93, %c0_94, %c0_95] : memref<5x1x128xf32, #tpu.memory_space<vmem>>, vector<1x1x128xf32>
    %183 = vector.shape_cast %182 : vector<1x1x128xf32> to vector<1x128xf32>
    %184 = vector.broadcast %183 : vector<1x128xf32> to vector<16x128xf32>
    %185 = arith.addf %181, %184 : vector<16x128xf32>
    %cst_96 = arith.constant 0.000000e+00 : f32
    %186 = vector.broadcast %cst_96 : f32 to vector<16x128xf32>
    %187 = arith.maximumf %185, %186 : vector<16x128xf32>
    %188 = math.absf %185 : vector<16x128xf32>
    %cst_97 = arith.constant 0.000000e+00 : f32
    %189 = vector.broadcast %cst_97 : f32 to vector<16x128xf32>
    %190 = arith.subf %189, %188 : vector<16x128xf32>
    %191 = math.exp %190 : vector<16x128xf32>
    %cst_98 = arith.constant 1.000000e+00 : f32
    %192 = vector.broadcast %cst_98 : f32 to vector<16x128xf32>
    %193 = arith.addf %192, %191 : vector<16x128xf32>
    %194 = math.log %193 : vector<16x128xf32>
    %195 = arith.addf %187, %194 : vector<16x128xf32>
    %cst_99 = arith.constant 0.693147182 : f32
    %196 = vector.broadcast %cst_99 : f32 to vector<16x128xf32>
    %197 = arith.subf %195, %196 : vector<16x128xf32>
    %c3_100 = arith.constant 3 : index
    %c0_101 = arith.constant 0 : index
    %c0_102 = arith.constant 0 : index
    %198 = vector.load %arg10[%c3_100, %c0_101, %c0_102] : memref<5x128x128xbf16, #tpu.memory_space<vmem>>, vector<1x128x128xbf16>
    %199 = vector.shape_cast %198 : vector<1x128x128xbf16> to vector<128x128xbf16>
    %200 = arith.truncf %197 : vector<16x128xf32> to vector<16x128xbf16>
    %cst_103 = arith.constant dense<0.000000e+00> : vector<16x128xf32>
    %201 = tpu.matmul %200, %199, %cst_103 {dimension_numbers = #tpu.dot_dimension_numbers<[1], [0], [0], [1], [0, 0, 1, 1], [], []>} : vector<16x128xbf16>, vector<128x128xbf16>, vector<16x128xf32> -> vector<16x128xf32>
    %c3_104 = arith.constant 3 : index
    %c0_105 = arith.constant 0 : index
    %c0_106 = arith.constant 0 : index
    %202 = vector.load %arg11[%c3_104, %c0_105, %c0_106] : memref<5x1x128xf32, #tpu.memory_space<vmem>>, vector<1x1x128xf32>
    %203 = vector.shape_cast %202 : vector<1x1x128xf32> to vector<1x128xf32>
    %204 = vector.broadcast %203 : vector<1x128xf32> to vector<16x128xf32>
    %205 = arith.addf %201, %204 : vector<16x128xf32>
    %206 = arith.addf %165, %205 : vector<16x128xf32>
    %c0_107 = arith.constant 0 : index
    %c0_108 = arith.constant 0 : index
    %207 = vector.load %arg15[%c0_107, %c0_108] : memref<16x128xf32, #tpu.memory_space<vmem>>, vector<16x128xf32>
    tpu.vector_store %arg15[%c0_107, %c0_108], %206 {strides = array<i32>} : memref<16x128xf32, #tpu.memory_space<vmem>>, vector<16x128xf32>,
    %cst_109 = arith.constant 0.000000e+00 : f32
    %208 = vector.broadcast %cst_109 : f32 to vector<16x128xf32>
    %209 = arith.maximumf %206, %208 : vector<16x128xf32>
    %210 = math.absf %206 : vector<16x128xf32>
    %cst_110 = arith.constant 0.000000e+00 : f32
    %211 = vector.broadcast %cst_110 : f32 to vector<16x128xf32>
    %212 = arith.subf %211, %210 : vector<16x128xf32>
    %213 = math.exp %212 : vector<16x128xf32>
    %cst_111 = arith.constant 1.000000e+00 : f32
    %214 = vector.broadcast %cst_111 : f32 to vector<16x128xf32>
    %215 = arith.addf %214, %213 : vector<16x128xf32>
    %216 = math.log %215 : vector<16x128xf32>
    %217 = arith.addf %209, %216 : vector<16x128xf32>
    %cst_112 = arith.constant 0.693147182 : f32
    %218 = vector.broadcast %cst_112 : f32 to vector<16x128xf32>
    %219 = arith.subf %217, %218 : vector<16x128xf32>
    %c4 = arith.constant 4 : index
    %c0_113 = arith.constant 0 : index
    %c0_114 = arith.constant 0 : index
    %220 = vector.load %arg8[%c4, %c0_113, %c0_114] : memref<5x128x128xbf16, #tpu.memory_space<vmem>>, vector<1x128x128xbf16>
    %221 = vector.shape_cast %220 : vector<1x128x128xbf16> to vector<128x128xbf16>
    %222 = arith.truncf %219 : vector<16x128xf32> to vector<16x128xbf16>
    %cst_115 = arith.constant dense<0.000000e+00> : vector<16x128xf32>
    %223 = tpu.matmul %222, %221, %cst_115 {dimension_numbers = #tpu.dot_dimension_numbers<[1], [0], [0], [1], [0, 0, 1, 1], [], []>} : vector<16x128xbf16>, vector<128x128xbf16>, vector<16x128xf32> -> vector<16x128xf32>
    %c4_116 = arith.constant 4 : index
    %c0_117 = arith.constant 0 : index
    %c0_118 = arith.constant 0 : index
    %224 = vector.load %arg9[%c4_116, %c0_117, %c0_118] : memref<5x1x128xf32, #tpu.memory_space<vmem>>, vector<1x1x128xf32>
    %225 = vector.shape_cast %224 : vector<1x1x128xf32> to vector<1x128xf32>
    %226 = vector.broadcast %225 : vector<1x128xf32> to vector<16x128xf32>
    %227 = arith.addf %223, %226 : vector<16x128xf32>
    %cst_119 = arith.constant 0.000000e+00 : f32
    %228 = vector.broadcast %cst_119 : f32 to vector<16x128xf32>
    %229 = arith.maximumf %227, %228 : vector<16x128xf32>
    %230 = math.absf %227 : vector<16x128xf32>
    %cst_120 = arith.constant 0.000000e+00 : f32
    %231 = vector.broadcast %cst_120 : f32 to vector<16x128xf32>
    %232 = arith.subf %231, %230 : vector<16x128xf32>
    %233 = math.exp %232 : vector<16x128xf32>
    %cst_121 = arith.constant 1.000000e+00 : f32
    %234 = vector.broadcast %cst_121 : f32 to vector<16x128xf32>
    %235 = arith.addf %234, %233 : vector<16x128xf32>
    %236 = math.log %235 : vector<16x128xf32>
    %237 = arith.addf %229, %236 : vector<16x128xf32>
    %cst_122 = arith.constant 0.693147182 : f32
    %238 = vector.broadcast %cst_122 : f32 to vector<16x128xf32>
    %239 = arith.subf %237, %238 : vector<16x128xf32>
    %c4_123 = arith.constant 4 : index
    %c0_124 = arith.constant 0 : index
    %c0_125 = arith.constant 0 : index
    %240 = vector.load %arg10[%c4_123, %c0_124, %c0_125] : memref<5x128x128xbf16, #tpu.memory_space<vmem>>, vector<1x128x128xbf16>
    %241 = vector.shape_cast %240 : vector<1x128x128xbf16> to vector<128x128xbf16>
    %242 = arith.truncf %239 : vector<16x128xf32> to vector<16x128xbf16>
    %cst_126 = arith.constant dense<0.000000e+00> : vector<16x128xf32>
    %243 = tpu.matmul %242, %241, %cst_126 {dimension_numbers = #tpu.dot_dimension_numbers<[1], [0], [0], [1], [0, 0, 1, 1], [], []>} : vector<16x128xbf16>, vector<128x128xbf16>, vector<16x128xf32> -> vector<16x128xf32>
    %c4_127 = arith.constant 4 : index
    %c0_128 = arith.constant 0 : index
    %c0_129 = arith.constant 0 : index
    %244 = vector.load %arg11[%c4_127, %c0_128, %c0_129] : memref<5x1x128xf32, #tpu.memory_space<vmem>>, vector<1x1x128xf32>
    %245 = vector.shape_cast %244 : vector<1x1x128xf32> to vector<1x128xf32>
    %246 = vector.broadcast %245 : vector<1x128xf32> to vector<16x128xf32>
    %247 = arith.addf %243, %246 : vector<16x128xf32>
    %248 = arith.addf %206, %247 : vector<16x128xf32>
    %cst_130 = arith.constant 0.000000e+00 : f32
    %249 = vector.broadcast %cst_130 : f32 to vector<16x128xf32>
    %250 = arith.maximumf %248, %249 : vector<16x128xf32>
    %251 = math.absf %248 : vector<16x128xf32>
    %cst_131 = arith.constant 0.000000e+00 : f32
    %252 = vector.broadcast %cst_131 : f32 to vector<16x128xf32>
    %253 = arith.subf %252, %251 : vector<16x128xf32>
    %254 = math.exp %253 : vector<16x128xf32>
    %cst_132 = arith.constant 1.000000e+00 : f32
    %255 = vector.broadcast %cst_132 : f32 to vector<16x128xf32>
    %256 = arith.addf %255, %254 : vector<16x128xf32>
    %257 = math.log %256 : vector<16x128xf32>
    %258 = arith.addf %250, %257 : vector<16x128xf32>
    %cst_133 = arith.constant 0.693147182 : f32
    %259 = vector.broadcast %cst_133 : f32 to vector<16x128xf32>
    %260 = arith.subf %258, %259 : vector<16x128xf32>
    %c0_134 = arith.constant 0 : index
    %c0_135 = arith.constant 0 : index
    %c0_136 = arith.constant 0 : index
    %261 = vector.load %arg12[%c0_134, %c0_135, %c0_136] : memref<2x128x128xbf16, #tpu.memory_space<vmem>>, vector<1x128x128xbf16>
    %262 = vector.shape_cast %261 : vector<1x128x128xbf16> to vector<128x128xbf16>
    %263 = arith.truncf %260 : vector<16x128xf32> to vector<16x128xbf16>
    %cst_137 = arith.constant dense<0.000000e+00> : vector<16x128xf32>
    %264 = tpu.matmul %263, %262, %cst_137 {dimension_numbers = #tpu.dot_dimension_numbers<[1], [0], [0], [1], [0, 0, 1, 1], [], []>} : vector<16x128xbf16>, vector<128x128xbf16>, vector<16x128xf32> -> vector<16x128xf32>
    %c0_138 = arith.constant 0 : index
    %c0_139 = arith.constant 0 : index
    %c0_140 = arith.constant 0 : index
    %265 = vector.load %arg13[%c0_138, %c0_139, %c0_140] : memref<2x1x128xf32, #tpu.memory_space<vmem>>, vector<1x1x128xf32>
    %266 = vector.shape_cast %265 : vector<1x1x128xf32> to vector<1x128xf32>
    %267 = vector.broadcast %266 : vector<1x128xf32> to vector<16x128xf32>
    %268 = arith.addf %264, %267 : vector<16x128xf32>
    %cst_141 = arith.constant 0.000000e+00 : f32
    %269 = vector.broadcast %cst_141 : f32 to vector<16x128xf32>
    %270 = arith.maximumf %268, %269 : vector<16x128xf32>
    %271 = math.absf %268 : vector<16x128xf32>
    %cst_142 = arith.constant 0.000000e+00 : f32
    %272 = vector.broadcast %cst_142 : f32 to vector<16x128xf32>
    %273 = arith.subf %272, %271 : vector<16x128xf32>
    %274 = math.exp %273 : vector<16x128xf32>
    %cst_143 = arith.constant 1.000000e+00 : f32
    %275 = vector.broadcast %cst_143 : f32 to vector<16x128xf32>
    %276 = arith.addf %275, %274 : vector<16x128xf32>
    %277 = math.log %276 : vector<16x128xf32>
    %278 = arith.addf %270, %277 : vector<16x128xf32>
    %cst_144 = arith.constant 0.693147182 : f32
    %279 = vector.broadcast %cst_144 : f32 to vector<16x128xf32>
    %280 = arith.subf %278, %279 : vector<16x128xf32>
    %c1_145 = arith.constant 1 : index
    %c0_146 = arith.constant 0 : index
    %c0_147 = arith.constant 0 : index
    %281 = vector.load %arg12[%c1_145, %c0_146, %c0_147] : memref<2x128x128xbf16, #tpu.memory_space<vmem>>, vector<1x128x128xbf16>
    %282 = vector.shape_cast %281 : vector<1x128x128xbf16> to vector<128x128xbf16>
    %283 = arith.truncf %280 : vector<16x128xf32> to vector<16x128xbf16>
    %cst_148 = arith.constant dense<0.000000e+00> : vector<16x128xf32>
    %284 = tpu.matmul %283, %282, %cst_148 {dimension_numbers = #tpu.dot_dimension_numbers<[1], [0], [0], [1], [0, 0, 1, 1], [], []>} : vector<16x128xbf16>, vector<128x128xbf16>, vector<16x128xf32> -> vector<16x128xf32>
    %c1_149 = arith.constant 1 : index
    %c0_150 = arith.constant 0 : index
    %c0_151 = arith.constant 0 : index
    %285 = vector.load %arg13[%c1_149, %c0_150, %c0_151] : memref<2x1x128xf32, #tpu.memory_space<vmem>>, vector<1x1x128xf32>
    %286 = vector.shape_cast %285 : vector<1x1x128xf32> to vector<1x128xf32>
    %287 = vector.broadcast %286 : vector<1x128xf32> to vector<16x128xf32>
    %288 = arith.addf %284, %287 : vector<16x128xf32>
    %cst_152 = arith.constant 0.000000e+00 : f32
    %289 = vector.broadcast %cst_152 : f32 to vector<16x128xf32>
    %290 = arith.maximumf %288, %289 : vector<16x128xf32>
    %291 = math.absf %288 : vector<16x128xf32>
    %cst_153 = arith.constant 0.000000e+00 : f32
    %292 = vector.broadcast %cst_153 : f32 to vector<16x128xf32>
    %293 = arith.subf %292, %291 : vector<16x128xf32>
    %294 = math.exp %293 : vector<16x128xf32>
    %cst_154 = arith.constant 1.000000e+00 : f32
    %295 = vector.broadcast %cst_154 : f32 to vector<16x128xf32>
    %296 = arith.addf %295, %294 : vector<16x128xf32>
    %297 = math.log %296 : vector<16x128xf32>
    %298 = arith.addf %290, %297 : vector<16x128xf32>
    %cst_155 = arith.constant 0.693147182 : f32
    %299 = vector.broadcast %cst_155 : f32 to vector<16x128xf32>
    %300 = arith.subf %298, %299 : vector<16x128xf32>
    %c0_156 = arith.constant 0 : index
    %c0_157 = arith.constant 0 : index
    %301 = vector.load %arg14[%c0_156, %c0_157] : memref<128x128xbf16, #tpu.memory_space<vmem>>, vector<128x128xbf16>
    %302 = arith.truncf %300 : vector<16x128xf32> to vector<16x128xbf16>
    %cst_158 = arith.constant dense<0.000000e+00> : vector<16x128xf32>
    %303 = tpu.matmul %302, %301, %cst_158 {dimension_numbers = #tpu.dot_dimension_numbers<[1], [0], [0], [1], [0, 0, 1, 1], [], []>} : vector<16x128xbf16>, vector<128x128xbf16>, vector<16x128xf32> -> vector<16x128xf32>
    %c0_159 = arith.constant 0 : index
    %c0_160 = arith.constant 0 : index
    %304 = vector.load %arg16[%c0_159, %c0_160] : memref<16x128xf32, #tpu.memory_space<vmem>>, vector<16x128xf32>
    tpu.vector_store %arg16[%c0_159, %c0_160], %303 {strides = array<i32>} : memref<16x128xf32, #tpu.memory_space<vmem>>, vector<16x128xf32>,
    return
  }
  func.func @transform_0(%arg0: i32) -> (i32, i32) {
    %c0_i32 = arith.constant 0 : i32
    %c0_i32_0 = arith.constant 0 : i32
    return %arg0, %c0_i32 : i32, i32
  }
  func.func @transform_1(%arg0: i32) -> (i32, i32) {
    %c0_i32 = arith.constant 0 : i32
    %c0_i32_0 = arith.constant 0 : i32
    return %arg0, %c0_i32 : i32, i32
  }
  func.func @transform_2(%arg0: i32) -> (i32, i32) {
    %c0_i32 = arith.constant 0 : i32
    %c0_i32_0 = arith.constant 0 : i32
    %c0_i32_1 = arith.constant 0 : i32
    return %c0_i32, %c0_i32_0 : i32, i32
  }
  func.func @transform_3(%arg0: i32) -> (i32, i32) {
    %c0_i32 = arith.constant 0 : i32
    %c0_i32_0 = arith.constant 0 : i32
    %c0_i32_1 = arith.constant 0 : i32
    return %c0_i32, %c0_i32_0 : i32, i32
  }
  func.func @transform_4(%arg0: i32) -> (i32, i32) {
    %c0_i32 = arith.constant 0 : i32
    %c0_i32_0 = arith.constant 0 : i32
    %c0_i32_1 = arith.constant 0 : i32
    return %c0_i32, %c0_i32_0 : i32, i32
  }
  func.func @transform_5(%arg0: i32) -> (i32, i32) {
    %c0_i32 = arith.constant 0 : i32
    %c0_i32_0 = arith.constant 0 : i32
    %c0_i32_1 = arith.constant 0 : i32
    return %c0_i32, %c0_i32_0 : i32, i32
  }
  func.func @transform_6(%arg0: i32) -> (i32, i32) {
    %c0_i32 = arith.constant 0 : i32
    %c0_i32_0 = arith.constant 0 : i32
    %c0_i32_1 = arith.constant 0 : i32
    return %c0_i32, %c0_i32_0 : i32, i32
  }
  func.func @transform_7(%arg0: i32) -> (i32, i32, i32) {
    %c0_i32 = arith.constant 0 : i32
    %c0_i32_0 = arith.constant 0 : i32
    %c0_i32_1 = arith.constant 0 : i32
    %c0_i32_2 = arith.constant 0 : i32
    return %c0_i32, %c0_i32_0, %c0_i32_1 : i32, i32, i32
  }
  func.func @transform_8(%arg0: i32) -> (i32, i32, i32) {
    %c0_i32 = arith.constant 0 : i32
    %c0_i32_0 = arith.constant 0 : i32
    %c0_i32_1 = arith.constant 0 : i32
    %c0_i32_2 = arith.constant 0 : i32
    return %c0_i32, %c0_i32_0, %c0_i32_1 : i32, i32, i32
  }
  func.func @transform_9(%arg0: i32) -> (i32, i32, i32) {
    %c0_i32 = arith.constant 0 : i32
    %c0_i32_0 = arith.constant 0 : i32
    %c0_i32_1 = arith.constant 0 : i32
    %c0_i32_2 = arith.constant 0 : i32
    return %c0_i32, %c0_i32_0, %c0_i32_1 : i32, i32, i32
  }
  func.func @transform_10(%arg0: i32) -> (i32, i32, i32) {
    %c0_i32 = arith.constant 0 : i32
    %c0_i32_0 = arith.constant 0 : i32
    %c0_i32_1 = arith.constant 0 : i32
    %c0_i32_2 = arith.constant 0 : i32
    return %c0_i32, %c0_i32_0, %c0_i32_1 : i32, i32, i32
  }
  func.func @transform_11(%arg0: i32) -> (i32, i32, i32) {
    %c0_i32 = arith.constant 0 : i32
    %c0_i32_0 = arith.constant 0 : i32
    %c0_i32_1 = arith.constant 0 : i32
    %c0_i32_2 = arith.constant 0 : i32
    return %c0_i32, %c0_i32_0, %c0_i32_1 : i32, i32, i32
  }
  func.func @transform_12(%arg0: i32) -> (i32, i32, i32) {
    %c0_i32 = arith.constant 0 : i32
    %c0_i32_0 = arith.constant 0 : i32
    %c0_i32_1 = arith.constant 0 : i32
    %c0_i32_2 = arith.constant 0 : i32
    return %c0_i32, %c0_i32_0, %c0_i32_1 : i32, i32, i32
  }
  func.func @transform_13(%arg0: i32) -> (i32, i32) {
    %c0_i32 = arith.constant 0 : i32
    %c0_i32_0 = arith.constant 0 : i32
    %c0_i32_1 = arith.constant 0 : i32
    return %c0_i32, %c0_i32_0 : i32, i32
  }
  func.func @transform_14(%arg0: i32) -> (i32, i32) {
    %c0_i32 = arith.constant 0 : i32
    %c0_i32_0 = arith.constant 0 : i32
    return %arg0, %c0_i32 : i32, i32
  }
  func.func @transform_15(%arg0: i32) -> (i32, i32) {
    %c0_i32 = arith.constant 0 : i32
    %c0_i32_0 = arith.constant 0 : i32
    return %arg0, %c0_i32 : i32, i32
  }
}

</mosaic_0001>

<bundles_post_ra>
// kernel: forward.2
= control target key start
LH: loop header
LB: loop body
LE: loop exit
PB: predicated region body
PF: predicated region fallthrough
CT: control target
= control target key end

     0   :  { %s776_s15 = smov 0   ;;  %s915_s0 = inlined_call_operand.vmem [shape: f32[48,128], index: 0, kind: input, shape index: {}]   ;;  %s916_s1 = inlined_call_operand.vmem [shape: bf16[48,128], index: 1, kind: input, shape index: {}]   ;;  %s917_s2 = inlined_call_operand.vmem [shape: bf16[256,256], index: 2, kind: input, shape index: {}]   ;;  %s918_s3 = inlined_call_operand.vmem [shape: f32[1,128], index: 3, kind: input, shape index: {}]   ;;  %s919_s4 = inlined_call_operand.vmem [shape: f32[48,128], index: 4, kind: output, shape index: {}]  }
   0x1 LB: > { %s593_s16 = sadd.s32 4294967295, %s749_s15   ;;  %p597_p0 = scmp.ge.s32.totalorder %s749_s15, 1  ;;  %s749_s15 = sphi %s776_s15, %s14_s15  }
   0x2   : > { %p174_p1 = scmp.lt.s32.totalorder %s749_s15, 3 }
   0x4   : > { %p175_p2 = pnand %p597_p0, %p174_p1 }
   0x5   : > { %v681_v0 = vld [vmem:[%s917_s2 + $0x4] ss:$8 sps:$4 sm:$0xff] (!%p175_p2)   ;;  %v683_v1 = vld [vmem:[%s917_s2] ss:$8 sps:$4 sm:$0xff] (!%p175_p2)   ;;  %v684_v2 = vld [vmem:[%s917_s2 + $0x14] ss:$8 sps:$4 sm:$0xff] (!%p175_p2)  }
   0x6   : > { %178 = sbr.rel (%p175_p2) target bundleno = 289 (0x121), region = 36  ;;  %458 = vmatprep.subr.bf16.mxu0 (!%p175_p2), %v681_v0  ;;  %641 = vmatprep.subr.bf16.mxu1 (!%p175_p2), %v681_v0  ;;  %v686_v3 = vld [vmem:[%s917_s2 + $0x10] ss:$8 sps:$4 sm:$0xff] (!%p175_p2)   ;;  %v687_v4 = vld [vmem:[%s917_s2 + $0x24] ss:$8 sps:$4 sm:$0xff] (!%p175_p2)  }
   0x7   : > { %459 = vmatpush1.bf16.msra.mxu0 (!%p175_p2), %v683_v1  ;;  %657 = vmatpush1.bf16.msra.mxu1 (!%p175_p2), %v683_v1  ;;  %s205_s27 = smul.u32 (!%p175_p2), 3, %s593_s16  ;;  %v689_v5 = vld [vmem:[%s917_s2 + $0x20] ss:$8 sps:$4 sm:$0xff] (!%p175_p2)   ;;  %v690_v6 = vld [vmem:[%s917_s2 + $0x34] ss:$8 sps:$4 sm:$0xff] (!%p175_p2)  }
   0x8   : > { %460 = vmatprep.subr.bf16.mxu0 (!%p175_p2), %v684_v2  ;;  %642 = vmatprep.subr.bf16.mxu1 (!%p175_p2), %v684_v2  ;;  %v692_v7 = vld [vmem:[%s917_s2 + $0x30] ss:$8 sps:$4 sm:$0xff] (!%p175_p2)   ;;  %v693_v8 = vld [vmem:[%s917_s2 + $0x44] ss:$8 sps:$4 sm:$0xff] (!%p175_p2)   ;;  %v695_v9 = vld [vmem:[%s917_s2 + $0x40] ss:$8 sps:$4 sm:$0xff] (!%p175_p2)  }
   0x9   : > { %p206_p3 = scmp.lt.s32.totalorder (!%p175_p2), %s205_s27, 5  ;;  %v696_v10 = vld [vmem:[%s917_s2 + $0x54] ss:$8 sps:$4 sm:$0xff] (!%p175_p2)   ;;  %v698_v11 = vld [vmem:[%s917_s2 + $0x50] ss:$8 sps:$4 sm:$0xff] (!%p175_p2)  }
   0xa   : > { %v699_v12 = vld [vmem:[%s917_s2 + $0x64] ss:$8 sps:$4 sm:$0xff] (!%p175_p2)   ;;  %v701_v13 = vld [vmem:[%s917_s2 + $0x60] ss:$8 sps:$4 sm:$0xff] (!%p175_p2)   ;;  %v702_v19 = vld [vmem:[%s917_s2 + $0x74] ss:$8 sps:$4 sm:$0xff] (!%p175_p2)  }
   0xb   : > { %461 = vmatpush1.bf16.msra.mxu0 (!%p175_p2), %v686_v3  ;;  %658 = vmatpush1.bf16.msra.mxu1 (!%p175_p2), %v686_v3  ;;  %v704_v25 = vld [vmem:[%s917_s2 + $0x70] ss:$8 sps:$4 sm:$0xff] (!%p175_p2)   ;;  %v705_v27 = vld [vmem:[%s917_s2 + $0x84] ss:$8 sps:$4 sm:$0xff] (!%p175_p2)   ;;  %v707_v31 = vld [vmem:[%s917_s2 + $0x80] ss:$8 sps:$4 sm:$0xff] (!%p175_p2)  }
   0xc   : > { %462 = vmatprep.subr.bf16.mxu0 (!%p175_p2), %v687_v4  ;;  %643 = vmatprep.subr.bf16.mxu1 (!%p175_p2), %v687_v4  ;;  %v708_v32 = vld [vmem:[%s917_s2 + $0x94] ss:$8 sps:$4 sm:$0xff] (!%p175_p2)   ;;  %v710_v33 = vld [vmem:[%s917_s2 + $0x90] ss:$8 sps:$4 sm:$0xff] (!%p175_p2)   ;;  %v711_v34 = vld [vmem:[%s917_s2 + $0xa4] ss:$8 sps:$4 sm:$0xff] (!%p175_p2)  }
   0xd   : > { %s921_s27 = smov (!%p206_p3, %s205_s27), 5  ;;  %v713_v35 = vld [vmem:[%s917_s2 + $0xa0] ss:$8 sps:$4 sm:$0xff]   ;;  %v714_v37 = vld [vmem:[%s917_s2 + $0xb4] ss:$8 sps:$4 sm:$0xff]  }
   0xe   : > { %s599_s14 = sshll.u32 %s921_s27, 2  ;;  %s598_s16 = sshll.u32 %s921_s27, 3  ;;  %v716_v42 = vld [vmem:[%s917_s2 + $0xb0] ss:$8 sps:$4 sm:$0xff]   ;;  %v717_v44 = vld [vmem:[%s917_s2 + $0xc4] ss:$8 sps:$4 sm:$0xff]  }
   0xf   : > { %463 = vmatpush1.bf16.msra.mxu0 %v689_v5  ;;  %659 = vmatpush1.bf16.msra.mxu1 %v689_v5  ;;  %s215_s21 = scalar_lea.vmem %s916_s1, %s599_s14  ;;  %s209_s26 = scalar_lea.vmem %s915_s0, %s598_s16  ;;  %v719_v45 = vld [vmem:[%s917_s2 + $0xc0] ss:$8 sps:$4 sm:$0xff]   ;;  %v720_v46 = vld [vmem:[%s917_s2 + $0xd4] ss:$8 sps:$4 sm:$0xff]   ;;  %v722_v47 = vld [vmem:[%s917_s2 + $0xd0] ss:$8 sps:$4 sm:$0xff]  }
  0x10   : > { %464 = vmatprep.subr.bf16.mxu0 %v690_v6  ;;  %644 = vmatprep.subr.bf16.mxu1 %v690_v6  ;;  %v729_v14 = vld [vmem:[%s215_s21] sm:$0xff]   ;;  %v730_v15 = vld [vmem:[%s215_s21 + $0x8] ss:$0 sps:$4 sm:$0xff]   ;;  %v842_v18 = vld [vmem:[%s209_s26 + $0x10] sm:$0xff]  ;;  %s221_s23 = scalar_lea.vmem %s919_s4, %s598_s16 }
  0x11   : > { %v838_v16 = vld [vmem:[%s209_s26] sm:$0xff]  ;;  %v840_v17 = vld [vmem:[%s209_s26 + $0x8] sm:$0xff]  ;;  %490 = vmatprep.mubr.bf16.mxu0 %v729_v14  ;;  %500 = vmatprep.mubr.bf16.mxu1 %v730_v15  ;;  %v231_v22 = vand.u32 2147483647, %v842_v18  ;;  %v228_v54 = vmax.f32 %v842_v18, 0.0 }
  0x12   : > { %v229_v20 = vand.u32 2147483647, %v838_v16  ;;  %v230_v21 = vand.u32 2147483647, %v840_v17  ;;  %v723_v48 = vld [vmem:[%s917_s2 + $0xe4] ss:$8 sps:$4 sm:$0xff]  }
  0x13   : > { %465 = vmatpush1.bf16.msra.mxu0 %v692_v7  ;;  %660 = vmatpush1.bf16.msra.mxu1 %v692_v7  ;;  %v234_v26 = vsub.f32 0.0, %v231_v22  ;;  %v226_v49 = vmax.f32 %v838_v16, 0.0  ;;  %v227_v51 = vmax.f32 %v840_v17, 0.0  ;;  %v725_v56 = vld [vmem:[%s917_s2 + $0xe0] ss:$8 sps:$4 sm:$0xff]  }
  0x14   : > { %466 = vmatprep.subr.bf16.mxu0 %v693_v8  ;;  %645 = vmatprep.subr.bf16.mxu1 %v693_v8  ;;  %v232_v23 = vsub.f32 0.0, %v229_v20  ;;  %v233_v24 = vsub.f32 0.0, %v230_v21  ;;  %v726_v58 = vld [vmem:[%s917_s2 + $0xf4] ss:$8 sps:$4 sm:$0xff]   ;;  %v728_v0 = vld [vmem:[%s917_s2 + $0xf0] ss:$8 sps:$4 sm:$0xff]  }
  0x15   : > { %v239_v30 = vmul.f32 1.442695, %v234_v26  ;;  %v638_v5 = vld [vmem:[%s918_s3] ss:$0 sm:$0xff] }
  0x16   : > { %v235_v28 = vmul.f32 1.442695, %v232_v23  ;;  %v237_v29 = vmul.f32 1.442695, %v233_v24 }
  0x17   : > { %467 = vmatpush1.bf16.msra.mxu0 %v695_v9  ;;  %661 = vmatpush1.bf16.msra.mxu1 %v695_v9 }
  0x18   : > { %468 = vmatprep.subr.bf16.mxu0 %v696_v10  ;;  %646 = vmatprep.subr.bf16.mxu1 %v696_v10  ;;  %731 = vpow2.f32 %v235_v28 }
  0x19   : > { %733 = vpow2.f32 %v237_v29 }
  0x1a   : > { %735 = vpow2.f32 %v239_v30 }
  0x1b   : > { %469 = vmatpush1.bf16.msra.mxu0 %v698_v11  ;;  %662 = vmatpush1.bf16.msra.mxu1 %v698_v11 }
  0x1c   : > { %470 = vmatprep.subr.bf16.mxu0 %v699_v12  ;;  %647 = vmatprep.subr.bf16.mxu1 %v699_v12 }
  0x1f   : > { %471 = vmatpush1.bf16.msra.mxu0 %v701_v13  ;;  %663 = vmatpush1.bf16.msra.mxu1 %v701_v13 }
  0x20   : > { %472 = vmatprep.subr.bf16.mxu0 %v702_v19  ;;  %648 = vmatprep.subr.bf16.mxu1 %v702_v19 }
  0x22   : > { %v732_v36 = vpop.eup %731 }
  0x23   : > { %473 = vmatpush1.bf16.msra.mxu0 %v704_v25  ;;  %664 = vmatpush1.bf16.msra.mxu1 %v704_v25  ;;  %v734_v38 = vpop.eup %733  ;;  %v241_v39 = vadd.f32 1.0, %v732_v36 }
  0x24   : > { %474 = vmatprep.subr.bf16.mxu0 %v705_v27  ;;  %649 = vmatprep.subr.bf16.mxu1 %v705_v27  ;;  %v736_v40 = vpop.eup %735  ;;  %v242_v41 = vadd.f32 1.0, %v734_v38 }
  0x25   : > { %737 = vlog2.f32 %v241_v39  ;;  %v243_v43 = vadd.f32 1.0, %v736_v40 }
  0x26   : > { %739 = vlog2.f32 %v242_v41 }
  0x27   : > { %475 = vmatpush1.bf16.msra.mxu0 %v707_v31  ;;  %665 = vmatpush1.bf16.msra.mxu1 %v707_v31  ;;  %741 = vlog2.f32 %v243_v43 }
  0x28   : > { %476 = vmatprep.subr.bf16.mxu0 %v708_v32  ;;  %650 = vmatprep.subr.bf16.mxu1 %v708_v32 }
  0x2b   : > { %477 = vmatpush1.bf16.msra.mxu0 %v710_v33  ;;  %666 = vmatpush1.bf16.msra.mxu1 %v710_v33 }
  0x2c   : > { %478 = vmatprep.subr.bf16.mxu0 %v711_v34  ;;  %651 = vmatprep.subr.bf16.mxu1 %v711_v34 }
  0x2f   : > { %479 = vmatpush1.bf16.msra.mxu0 %v713_v35  ;;  %667 = vmatpush1.bf16.msra.mxu1 %v713_v35  ;;  %v738_v50 = vpop.eup %737 }
  0x30   : > { %480 = vmatprep.subr.bf16.mxu0 %v714_v37  ;;  %652 = vmatprep.subr.bf16.mxu1 %v714_v37  ;;  %v740_v52 = vpop.eup %739  ;;  %v245_v53 = vmul.f32 0.6931472, %v738_v50 }
  0x31   : > { %v742_v55 = vpop.eup %741  ;;  %v247_v57 = vmul.f32 0.6931472, %v740_v52 }
  0x32   : > { %v250_v59 = vadd.f32 %v245_v53, %v226_v49  ;;  %v249_v60 = vmul.f32 0.6931472, %v742_v55 }
  0x33   : > { %481 = vmatpush1.bf16.msra.mxu0 %v716_v42  ;;  %668 = vmatpush1.bf16.msra.mxu1 %v716_v42  ;;  %v251_v61 = vadd.f32 %v247_v57, %v227_v51 }
  0x34   : > { %482 = vmatprep.subr.bf16.mxu0 %v717_v44  ;;  %653 = vmatprep.subr.bf16.mxu1 %v717_v44  ;;  %v601_v62 = vadd.f32 -0.6931472, %v250_v59  ;;  %v252_v63 = vadd.f32 %v249_v60, %v228_v54 }
  0x35   : > { %v602_v1 = vadd.f32 -0.6931472, %v251_v61 }
  0x36   : > { %v603_v2 = vadd.f32 -0.6931472, %v252_v63 }
  0x37   : > { %483 = vmatpush1.bf16.msra.mxu0 %v719_v45  ;;  %669 = vmatpush1.bf16.msra.mxu1 %v719_v45  ;;  %v262_v3 = vpack.c.bf16 %v602_v1, %v601_v62 }
  0x38   : > { %484 = vmatprep.subr.bf16.mxu0 %v720_v46  ;;  %654 = vmatprep.subr.bf16.mxu1 %v720_v46  ;;  %v264_v4 = vpack.c.bf16 %v603_v2, %v603_v2 }
  0x3b   : > { %485 = vmatpush1.bf16.msra.mxu0 %v722_v47  ;;  %670 = vmatpush1.bf16.msra.mxu1 %v722_v47 }
  0x3c   : > { %486 = vmatprep.subr.bf16.mxu0 %v723_v48  ;;  %655 = vmatprep.subr.bf16.mxu1 %v723_v48 }
  0x3f   : > { %487 = vmatpush1.bf16.msra.mxu0 %v725_v56  ;;  %671 = vmatpush1.bf16.msra.mxu1 %v725_v56 }
  0x40   : > { %488 = vmatprep.subr.bf16.mxu0 %v726_v58  ;;  %656 = vmatprep.subr.bf16.mxu1 %v726_v58 }
  0x43   : > { %489 = vmatpush1.bf16.msra.mxu0 %v728_v0  ;;  %672 = vmatpush1.bf16.msra.mxu1 %v728_v0 }
  0x46   : > { %491 = vmatmul.mubr.bf16.vlgmr.msra.gmra.mrb[0].mxu0 %v262_v3  ;;  %501 = vmatmul.mubr.bf16.vlgmr.msra.gmra.mrb[0].mxu1 %v264_v4 }
 0x119   : > { %v492_v6 = vpop.f32.mrb[0].mxu0  ;;  %v502_v7 = vpop.f32.mrb[0].mxu1 }
 0x11a   : > { %v516_v8 = vadd.f32 %v638_v5, %v492_v6  ;;  %v518_v9 = vadd.f32 %v638_v5, %v502_v7  ;;  %v494_v10 = vpop.f32.mrb[1].mxu0  ;;  %v504_v11 = vpop.f32.mrb[1].mxu1 }
 0x11b   : > { %v496_v12 = vpop.f32.mrb[2].mxu0  ;;  %v506_v13 = vpop.f32.mrb[2].mxu1 }
 0x11c   : > { %v519_v14 = vmul.f32 %v516_v8, %v494_v10  ;;  %v521_v15 = vmul.f32 %v518_v9, %v504_v11  ;;  %v517_v16 = vadd.f32 %v638_v5, %v496_v12  ;;  %v498_v17 = vpop.f32.mrb[3].mxu0  ;;  %v507_v18 = vpop.f32.mrb[3].mxu1 }
 0x11e   : > { %522 = vst [vmem:[%s221_s23] sm:$0xff] %v519_v14  ;;  %524 = vst [vmem:[%s221_s23 + $0x10] sm:$0xff] %v521_v15  ;;  %v520_v19 = vmul.f32 %v517_v16, %v498_v17 }
 0x120   : > { %523 = vst [vmem:[%s221_s23 + $0x8] sm:$0xff] %v520_v19 }
 0x121 PF: > { %s14_s15 = sadd.s32 1, %s749_s15  }
 0x122   : > { %p11_p4 = scmp.ge.s32.totalorder %s14_s15, 4  }
 0x124   :  { %13 = sbr.rel (!%p11_p4) target bundleno = 1 (0x1), region = 69 }

// kernel: forward.3
= control target key start
LH: loop header
LB: loop body
LE: loop exit
PB: predicated region body
PF: predicated region fallthrough
CT: control target
= control target key end

     0   :  { %s4706_s0 = inlined_call_operand.vmem [shape: f32[32,128], index: 0, kind: input, shape index: {}]   ;;  %s4707_s1 = inlined_call_operand.vmem [shape: f32[32,128], index: 1, kind: input, shape index: {}]   ;;  %s4708_s2 = inlined_call_operand.vmem [shape: bf16[128,128], index: 2, kind: input, shape index: {}]   ;;  %s4709_s3 = inlined_call_operand.vmem [shape: f32[1,128], index: 3, kind: input, shape index: {}]   ;;  %s4710_s4 = inlined_call_operand.hbm [shape: f32[1,128], index: 4, kind: input, shape index: {}]   ;;  %s4711_s5 = inlined_call_operand.vmem [shape: bf16[128,128], index: 5, kind: input, shape index: {}]   ;;  %s4712_s6 = inlined_call_operand.vmem [shape: f32[1,128], index: 6, kind: input, shape index: {}]   ;;  %s4713_s7 = inlined_call_operand.vmem [shape: bf16[5,128,128], index: 7, kind: input, shape index: {}]   ;;  %s4714_s8 = inlined_call_operand.vmem [shape: f32[5,1,128], index: 8, kind: input, shape index: {}]   ;;  %s4715_s9 = inlined_call_operand.vmem [shape: bf16[5,128,128], index: 9, kind: input, shape index: {}]   ;;  %s4716_s10 = inlined_call_operand.hbm [shape: f32[5,1,128], index: 10, kind: input, shape index: {}]   ;;  %s4717_s11 = inlined_call_operand.vmem [shape: bf16[2,128,128], index: 11, kind: input, shape index: {}]   ;;  %s4718_s12 = inlined_call_operand.vmem [shape: f32[2,1,128], index: 12, kind: input, shape index: {}]   ;;  %s4719_s13 = inlined_call_operand.hbm [shape: bf16[128,128], index: 13, kind: input, shape index: {}]   ;;  %s4720_s14 = inlined_call_operand.vmem [shape: f32[32,128], index: 14, kind: output, shape index: {0}]   ;;  %s4721_s15 = inlined_call_operand.vmem [shape: f32[32,128], index: 15, kind: output, shape index: {1}]  }
   0x1   :  { %4725 = sst [smem:[#allocation9_spill]] %s4717_s11 }
   0x2   :  { %4726 = sst [smem:[#allocation10_spill]] %s4718_s12 }
   0x3   :  { %4727 = sst [smem:[#allocation11_spill]] %s4720_s14 }
   0x4   :  { %4728 = sst [smem:[#allocation12_spill]] %s4721_s15 }
   0x5   :  { %21 = vsyncpa [#allocation3], 0 }
   0x6   :  { %22 = vsyncpa [#allocation5], 0  ;;  %s3993_s18 = smov 0  }
   0x7 LB: > { %s3904_s19 = smov [#allocation4]   ;;  %s4722_s21 = sadd.s32 4294967295, %s3902_s18   ;;  %s3902_s18 = sphi %s3993_s18, %s28_s18  }
   0x8   : > { %s433_s20 = sshll.u32 %s3904_s19, 4  ;;  %p2749_p0 = scmp.ge.s32.totalorder %s3902_s18, 1  ;;  %s4007_s20 = int_to_ptr.vmem [resolvable:$true] %s433_s20 }
   0x9   : > { %p389_p1 = scmp.lt.s32.totalorder %s3902_s18, 3  ;;  %p4003_p2 = scmp.eq.s32.totalorder %s4722_s21, 0 }
   0xa   : > { %s3905_s24 = smov [#allocation2]   ;;  %s3906_s27 = smov [#allocation6]  }
   0xb   : > { %p4009_p3 = pnand %p2749_p0, %p389_p1  ;;  %s408_s25 = sshll.u32 %s3905_s24, 4  ;;  %s4015_s25 = int_to_ptr.vmem [resolvable:$true] %s408_s25 }
   0xc   : > { %s452_s28 = sshll.u32 %s3906_s27, 4  ;;  %s3804_s16 = scalar_lea.hbm %s4716_s10, 80  ;;  %s4023_s28 = int_to_ptr.vmem [resolvable:$true] %s452_s28 }
   0xd   : > { %p3529_p4 = pneg %p4009_p3  ;;  %p3805_p6 = scmp.ne.s32.totalorder %s4716_s10, %s3804_s16 }
   0xe   : > { %p3811_p10 = scmp.lt.u32.totalorder %s3804_s16, %s4716_s10 }
   0xf   : > { %p4019_p5 = pnand %p4003_p2, %p3529_p4 }
  0x11   : > { %p4033_p7 = pneg %p4019_p5 }
  0x13   : > { %p3807_p8 = pnand %p4033_p7, %p3805_p6 }
  0x15   : > { %p3808_p9 = pneg %p3807_p8 }
  0x17   : > { %p3813_p11 = pnand %p3811_p10, %p3808_p9 }
  0x19   : > { %3816 = shalt.err (!%p3813_p11)
}
  0x1a   : > { %s3817_s29 = scalar_lea.vmem %s4007_s20, 80  ;;  %s3824_s30 = scalar_lea.vmem %s4007_s20, 96 }
  0x1b   : > { %p3818_p12 = scmp.ne.s32.totalorder %s4007_s20, %s3817_s29  ;;  %p3825_p1 = scmp.lt.s32.totalorder %s4007_s20, %s4007_s20 }
  0x1c   : > { %p3826_p4 = scmp.lt.s32.totalorder %s3824_s30, %s3817_s29 }
  0x1d   : > { %p3820_p13 = pnand %p3818_p12, %p4033_p7 }
  0x1e   : > { %p3827_p6 = por %p3826_p4, %p3825_p1 }
  0x1f   : > { %p3821_p0 = pneg %p3820_p13 }
  0x21   : > { %p3828_p8 = pnand %p3827_p6, %p3821_p0 }
  0x23   : > { %3831 = shalt.err (!%p3828_p8)
}
  0x24   : > { %s3907_s21 = smov 16   ;;  %s3908_s16 = smov 1  }
  0x25   : > { %3535 = dma.hbm_to_vmem [thread:$0]  (!%p4019_p5), %s4716_s10, 80, %s4007_s20, [#allocation5], %s3907_s21, %s3907_s21, %s3908_s16  }
  0x26   : > { %s3832_s12 = scalar_lea.hbm %s4710_s4, 16 }
  0x27   : > { %p3833_p9 = scmp.ne.s32.totalorder %s4710_s4, %s3832_s12  ;;  %p3839_p12 = scmp.lt.u32.totalorder %s3832_s12, %s4710_s4 }
  0x29   : > { %p3835_p10 = pnand %p3833_p9, %p4033_p7 }
  0x2b   : > { %p3836_p11 = pneg %p3835_p10 }
  0x2d   : > { %p3841_p13 = pnand %p3839_p12, %p3836_p11 }
  0x2f   : > { %3844 = shalt.err (!%p3841_p13)
}
  0x30   : > { %s3845_s15 = scalar_lea.vmem %s4015_s25, 16  ;;  %s3852_s11 = scalar_lea.vmem %s4015_s25, 32 }
  0x31   : > { %p3846_p0 = scmp.ne.s32.totalorder %s4015_s25, %s3845_s15  ;;  %p3853_p6 = scmp.lt.s32.totalorder %s4015_s25, %s4015_s25 }
  0x32   : > { %p3854_p8 = scmp.lt.s32.totalorder %s3852_s11, %s3845_s15 }
  0x33   : > { %p3848_p1 = pnand %p3846_p0, %p4033_p7 }
  0x34   : > { %p3855_p9 = por %p3854_p8, %p3853_p6 }
  0x35   : > { %p3849_p4 = pneg %p3848_p1 }
  0x37   : > { %p3856_p10 = pnand %p3855_p9, %p3849_p4 }
  0x39   : > { %3859 = shalt.err (!%p3856_p10)
}
  0x3a   : > { %3532 = dma.hbm_to_vmem [thread:$0]  (!%p4019_p5), %s4710_s4, 16, %s4015_s25, [#allocation3]  }
  0x3b   : > { %s3860_s16 = scalar_lea.hbm %s4719_s13, 1024 }
  0x3c   : > { %p3861_p11 = scmp.ne.s32.totalorder %s4719_s13, %s3860_s16  ;;  %p3867_p0 = scmp.lt.u32.totalorder %s3860_s16, %s4719_s13 }
  0x3e   : > { %p3863_p12 = pnand %p3861_p11, %p4033_p7 }
  0x40   : > { %p3864_p13 = pneg %p3863_p12 }
  0x42   : > { %p3869_p1 = pnand %p3867_p0, %p3864_p13 }
  0x44   : > { %3872 = shalt.err (!%p3869_p1)
}
  0x45   : > { %s3873_s25 = scalar_lea.vmem %s4023_s28, 1024  ;;  %p3881_p9 = scmp.lt.s32.totalorder %s4023_s28, %s4023_s28 }
  0x46   : > { %p3874_p4 = scmp.ne.s32.totalorder %s4023_s28, %s3873_s25  ;;  %p3882_p10 = scmp.lt.s32.totalorder %s3873_s25, %s3873_s25 }
  0x48   : > { %p3876_p6 = pnand %p3874_p4, %p4033_p7  ;;  %p3883_p11 = por %p3882_p10, %p3881_p9 }
  0x4a   : > { %p3877_p8 = pneg %p3876_p6 }
  0x4c   : > { %p3884_p12 = pnand %p3883_p11, %p3877_p8 }
  0x4e   : > { %3887 = shalt.err (!%p3884_p12)
}
  0x4f   : > { %s3909_s30 = smov 64   ;;  %s3910_s15 = smov 4  }
  0x50   : > { %3538 = dma.hbm_to_vmem [thread:$0]  (!%p4019_p5), %s4719_s13, 1024, %s4023_s28, [#allocation5], %s3909_s30, %s3909_s30, %s3910_s15  }
  0x51   : > { %486 = sbr.rel (%p4009_p3) target bundleno = 3923 (0xf53), region = 76 }
  0x58   : > { %3893 = dma.done.wait (%p4003_p2), [#allocation3], 16  }
  0x59   : > { %3895 = vsyncadd (%p4003_p2), [#allocation3], 4294967280 }
  0x5a   : > { %3897 = dma.done.wait (%p4003_p2), [#allocation5], 1104  }
  0x5b   : > { %3899 = vsyncadd (%p4003_p2), [#allocation5], 4294966192  ;;  %s4733_s26 = sadd.s32 4294967295, %s3902_s18   ;;  %v3911_v0 = vmov 0.0   ;;  %vm3912_vm0 = vmmov 0   ;;  %v3562_v1 = vld [vmem:[%s4708_s2] sm:$0xff]  }
  0x5c   : > { %s2758_s24 = sshll.u32 %s4733_s26, 1  ;;  %3217 = vmatprep.subr.bf16.mxu0 %v3911_v0  ;;  %3233 = vmatprep.mubr.msk.bf16.mxu0 %vm3912_vm0, %v3911_v0  ;;  %v3563_v2 = vld [vmem:[%s4708_s2 + $0x8] sm:$0xff]   ;;  %v3564_v3 = vld [vmem:[%s4708_s2 + $0x10] sm:$0xff]   ;;  %v3565_v6 = vld [vmem:[%s4708_s2 + $0x18] sm:$0xff]   ;;  %s4734_s26 = sld [smem:[#allocation11_spill]] }
  0x5d   : > { %p553_p3 = scmp.lt.s32.totalorder %s2758_s24, 3  ;;  %3237 = vmatprep.subr.bf16.mxu1 %v3911_v0  ;;  %3253 = vmatprep.mubr.msk.bf16.mxu1 %vm3912_vm0, %v3911_v0  ;;  %v3566_v11 = vld [vmem:[%s4708_s2 + $0x20] sm:$0xff]   ;;  %v3567_v14 = vld [vmem:[%s4708_s2 + $0x28] sm:$0xff]   ;;  %v3568_v15 = vld [vmem:[%s4708_s2 + $0x30] sm:$0xff]   ;;  %s4735_s14 = sld [smem:[#allocation9_spill]] }
  0x5e   : > { %3218 = vmatpush3.bf16.msra.mxu0 %v3562_v1  ;;  %v3569_v16 = vld [vmem:[%s4708_s2 + $0x38] sm:$0xff]   ;;  %v3570_v32 = vld [vmem:[%s4713_s7] sm:$0xff]   ;;  %v3571_v33 = vld [vmem:[%s4713_s7 + $0x8] sm:$0xff]   ;;  %s4737_s25 = sld [smem:[#allocation12_spill]] }
  0x5f   : > { %s4739_s24 = smov (!%p553_p3, %s2758_s24), 3  ;;  %3219 = vmatprep.subr.bf16.mxu0 %v3911_v0  ;;  %3238 = vmatpush3.bf16.msra.mxu1 %v3570_v32  ;;  %v3572_v34 = vld [vmem:[%s4713_s7 + $0x10] sm:$0xff]   ;;  %v3573_v35 = vld [vmem:[%s4713_s7 + $0x18] sm:$0xff]   ;;  %v3574_v36 = vld [vmem:[%s4713_s7 + $0x20] sm:$0xff]  }
  0x60   : > { %s4126_s20 = sshll.u32 %s4739_s24, 3  ;;  %3239 = vmatprep.subr.bf16.mxu1 %v3911_v0  ;;  %v3575_v37 = vld [vmem:[%s4713_s7 + $0x28] sm:$0xff]   ;;  %v3576_v38 = vld [vmem:[%s4713_s7 + $0x30] sm:$0xff]   ;;  %v3577_v39 = vld [vmem:[%s4713_s7 + $0x38] sm:$0xff]  }
  0x61   : > { %s4133_s17 = scalar_lea.vmem %s4706_s0, %s4126_s20  ;;  %s562_s21 = scalar_lea.vmem %s4707_s1, %s4126_s20  ;;  %v2768_v40 = vld [vmem:[%s4709_s3] ss:$0 sm:$0xff] }
  0x62   : > { %3220 = vmatpush3.bf16.msra.mxu0 %v3563_v2  ;;  %v577_v4 = vld [vmem:[%s4133_s17] sm:$0xff]  ;;  %v578_v5 = vld [vmem:[%s4133_s17 + $0x8] sm:$0xff]  ;;  %s568_s24 = scalar_lea.vmem %s4734_s26, %s4126_s20 }
  0x63   : > { %3221 = vmatprep.subr.bf16.mxu0 %v3911_v0  ;;  %v581_v7 = vand.u32 2147483647, %v577_v4  ;;  %v582_v8 = vand.u32 2147483647, %v578_v5  ;;  %v579_v19 = vmax.f32 %v577_v4, 0.0  ;;  %v580_v21 = vmax.f32 %v578_v5, 0.0  ;;  %3240 = vmatpush3.bf16.msra.mxu1 %v3571_v33 }
  0x64   : > { %3241 = vmatprep.subr.bf16.mxu1 %v3911_v0  ;;  %v712_v42 = vld [vmem:[%s562_s21] sm:$0xff]  ;;  %v713_v46 = vld [vmem:[%s562_s21 + $0x8] sm:$0xff]  ;;  %s4736_s21 = sld [smem:[#allocation10_spill]]  ;;  %s574_s30 = scalar_lea.vmem %s4737_s25, %s4126_s20 }
  0x65   : > { %v583_v9 = vsub.f32 0.0, %v581_v7  ;;  %v584_v10 = vsub.f32 0.0, %v582_v8 }
  0x66   : > { %3222 = vmatpush3.bf16.msra.mxu0 %v3564_v3 }
  0x67   : > { %3223 = vmatprep.subr.bf16.mxu0 %v3911_v0  ;;  %v585_v12 = vmul.f32 1.442695, %v583_v9  ;;  %v587_v13 = vmul.f32 1.442695, %v584_v10  ;;  %3242 = vmatpush3.bf16.msra.mxu1 %v3572_v34  ;;  %v3578_v9 = vld [vmem:[%s4715_s9] sm:$0xff]   ;;  %v3579_v10 = vld [vmem:[%s4715_s9 + $0x8] sm:$0xff]  }
  0x68   : > { %3243 = vmatprep.subr.bf16.mxu1 %v3911_v0 }
  0x69   : > { %3682 = vpow2.f32 %v585_v12  ;;  %v3581_v12 = vld [vmem:[%s4715_s9 + $0x18] sm:$0xff]  }
  0x6a   : > { %3224 = vmatpush3.bf16.msra.mxu0 %v3565_v6  ;;  %3684 = vpow2.f32 %v587_v13  ;;  %v3582_v13 = vld [vmem:[%s4715_s9 + $0x20] sm:$0xff]  }
  0x6b   : > { %3225 = vmatprep.subr.bf16.mxu0 %v3911_v0  ;;  %3244 = vmatpush3.bf16.msra.mxu1 %v3573_v35 }
  0x6c   : > { %3245 = vmatprep.subr.bf16.mxu1 %v3911_v0 }
  0x6e   : > { %3226 = vmatpush3.bf16.msra.mxu0 %v3566_v11  ;;  %v3580_v11 = vld [vmem:[%s4715_s9 + $0x10] sm:$0xff]  }
  0x6f   : > { %3227 = vmatprep.subr.bf16.mxu0 %v3911_v0  ;;  %3246 = vmatpush3.bf16.msra.mxu1 %v3574_v36 }
  0x70   : > { %3247 = vmatprep.subr.bf16.mxu1 %v3911_v0 }
  0x72   : > { %3228 = vmatpush3.bf16.msra.mxu0 %v3567_v14  ;;  %v3583_v14 = vld [vmem:[%s4715_s9 + $0x28] sm:$0xff]  }
  0x73   : > { %3229 = vmatprep.subr.bf16.mxu0 %v3911_v0  ;;  %v3683_v17 = vpop.eup %3682  ;;  %3248 = vmatpush3.bf16.msra.mxu1 %v3575_v37 }
  0x74   : > { %v3685_v18 = vpop.eup %3684  ;;  %v589_v20 = vadd.f32 1.0, %v3683_v17  ;;  %3249 = vmatprep.subr.bf16.mxu1 %v3911_v0  ;;  %v2779_v17 = vld [vmem:[%s4714_s8] ss:$0 sm:$0xff] }
  0x75   : > { %v590_v22 = vadd.f32 1.0, %v3685_v18 }
  0x76   : > { %3230 = vmatpush3.bf16.msra.mxu0 %v3568_v15  ;;  %3686 = vlog2.f32 %v589_v20  ;;  %v3584_v15 = vld [vmem:[%s4715_s9 + $0x30] sm:$0xff]  }
  0x77   : > { %3231 = vmatprep.subr.bf16.mxu0 %v3911_v0  ;;  %3688 = vlog2.f32 %v590_v22  ;;  %3250 = vmatpush3.bf16.msra.mxu1 %v3576_v38 }
  0x78   : > { %3251 = vmatprep.subr.bf16.mxu1 %v3911_v0 }
  0x7a   : > { %3232 = vmatpush3.bf16.msra.mxu0 %v3569_v16  ;;  %v3585_v16 = vld [vmem:[%s4715_s9 + $0x38] sm:$0xff]  }
  0x7b   : > { %3257 = vmatprep.subr.bf16.mxu0 %v3911_v0  ;;  %3252 = vmatpush3.bf16.msra.mxu1 %v3577_v39 }
  0x7c   : > { %3277 = vmatprep.subr.bf16.mxu1 %v3911_v0 }
  0x80   : > { %v3687_v23 = vpop.eup %3686 }
  0x81   : > { %v3689_v24 = vpop.eup %3688  ;;  %v592_v25 = vmul.f32 0.6931472, %v3687_v23 }
  0x82   : > { %v594_v26 = vmul.f32 0.6931472, %v3689_v24 }
  0x83   : > { %v595_v27 = vadd.f32 %v592_v25, %v579_v19 }
  0x84   : > { %v596_v28 = vadd.f32 %v594_v26, %v580_v21 }
  0x85   : > { %v2766_v29 = vadd.f32 -0.6931472, %v595_v27 }
  0x86   : > { %v2767_v30 = vadd.f32 -0.6931472, %v596_v28 }
  0x88   : > { %v615_v31 = vpack.c.bf16 %v2767_v30, %v2766_v29 }
  0x8a   : > { %3234 = vmatmul.mubr.bf16.vlgmr.msra.gmra.mrb[0].mxu0 %v615_v31 }
  0x8b   : > { %3273 = vmatprep.mubr.msk.bf16.mxu0 %vm3912_vm0, %v3911_v0  ;;  %3258 = vmatpush3.bf16.msra.mxu0 %v3578_v9 }
  0x8c   : > { %3259 = vmatprep.subr.bf16.mxu0 %v3911_v0 }
  0x8f   : > { %3260 = vmatpush3.bf16.msra.mxu0 %v3579_v10 }
  0x90   : > { %3261 = vmatprep.subr.bf16.mxu0 %v3911_v0 }
  0x93   : > { %3262 = vmatpush3.bf16.msra.mxu0 %v3580_v11 }
  0x94   : > { %3263 = vmatprep.subr.bf16.mxu0 %v3911_v0 }
  0x97   : > { %3264 = vmatpush3.bf16.msra.mxu0 %v3581_v12 }
  0x98   : > { %3265 = vmatprep.subr.bf16.mxu0 %v3911_v0 }
  0x9b   : > { %3266 = vmatpush3.bf16.msra.mxu0 %v3582_v13 }
  0x9c   : > { %3267 = vmatprep.subr.bf16.mxu0 %v3911_v0 }
  0x9f   : > { %3268 = vmatpush3.bf16.msra.mxu0 %v3583_v14 }
  0xa0   : > { %3269 = vmatprep.subr.bf16.mxu0 %v3911_v0 }
  0xa3   : > { %3270 = vmatpush3.bf16.msra.mxu0 %v3584_v15 }
  0xa4   : > { %3271 = vmatprep.subr.bf16.mxu0 %v3911_v0 }
  0xa7   : > { %3272 = vmatpush3.bf16.msra.mxu0 %v3585_v16 }
  0xa8   : > { %3297 = vmatprep.subr.bf16.mxu0 %v3911_v0 }
 0x15d   : > { %v705_v41 = vpop.f32.mrb[0].mxu0 }
 0x15e   : > { %v706_v43 = vadd.f32 %v2768_v40, %v705_v41  ;;  %v3235_v44 = vpop.f32.mrb[1].mxu0 }
 0x15f   : > { %v708_v45 = vpop.f32.mrb[2].mxu0 }
 0x160   : > { %v4203_v47 = vadd.f32 %v712_v42, %v706_v43  ;;  %v709_v48 = vadd.f32 %v2768_v40, %v708_v45  ;;  %v3236_v49 = vpop.f32.mrb[3].mxu0  ;;  %v3586_v45 = vld [vmem:[%s4713_s7 + $0x40] sm:$0xff]  }
 0x161   : > { %v3589_v49 = vld [vmem:[%s4713_s7 + $0x58] sm:$0xff]  }
 0x162   : > { %v718_v50 = vand.u32 2147483647, %v4203_v47  ;;  %v4206_v51 = vadd.f32 %v713_v46, %v709_v48  ;;  %v716_v62 = vmax.f32 %v4203_v47, 0.0  ;;  %v3587_v46 = vld [vmem:[%s4713_s7 + $0x48] sm:$0xff]   ;;  %v3588_v48 = vld [vmem:[%s4713_s7 + $0x50] sm:$0xff]  }
 0x164   : > { %v720_v52 = vsub.f32 0.0, %v718_v50  ;;  %v719_v53 = vand.u32 2147483647, %v4206_v51  ;;  %v717_v2 = vmax.f32 %v4206_v51, 0.0  ;;  %v3590_v50 = vld [vmem:[%s4713_s7 + $0x60] sm:$0xff]  }
 0x166   : > { %v722_v54 = vmul.f32 1.442695, %v720_v52  ;;  %v721_v55 = vsub.f32 0.0, %v719_v53  ;;  %v3591_v52 = vld [vmem:[%s4713_s7 + $0x68] sm:$0xff]   ;;  %v3592_v53 = vld [vmem:[%s4713_s7 + $0x70] sm:$0xff]  }
 0x168   : > { %3690 = vpow2.f32 %v722_v54  ;;  %v724_v56 = vmul.f32 1.442695, %v721_v55  ;;  %v3593_v54 = vld [vmem:[%s4713_s7 + $0x78] sm:$0xff]   ;;  %v2790_v55 = vld [vmem:[#allocation4] ss:$0 sm:$0xff] }
 0x16a   : > { %3692 = vpow2.f32 %v724_v56 }
 0x172   : > { %v3691_v57 = vpop.eup %3690 }
 0x173   : > { %v726_v58 = vadd.f32 1.0, %v3691_v57 }
 0x174   : > { %v3693_v59 = vpop.eup %3692 }
 0x175   : > { %v727_v60 = vadd.f32 1.0, %v3693_v59  ;;  %3694 = vlog2.f32 %v726_v58 }
 0x177   : > { %3696 = vlog2.f32 %v727_v60 }
 0x17f   : > { %v3695_v61 = vpop.eup %3694 }
 0x180   : > { %v729_v63 = vmul.f32 0.6931472, %v3695_v61 }
 0x181   : > { %v3697_v1 = vpop.eup %3696 }
 0x182   : > { %v731_v3 = vmul.f32 0.6931472, %v3697_v1  ;;  %v732_v4 = vadd.f32 %v729_v63, %v716_v62 }
 0x184   : > { %v733_v5 = vadd.f32 %v731_v3, %v717_v2  ;;  %v2777_v6 = vadd.f32 -0.6931472, %v732_v4 }
 0x186   : > { %v2778_v7 = vadd.f32 -0.6931472, %v733_v5 }
 0x188   : > { %v752_v8 = vpack.c.bf16 %v2778_v7, %v2777_v6 }
 0x18a   : > { %3254 = vmatmul.mubr.bf16.vlgmr.msra.gmra.mrb[0].mxu1 %v752_v8 }
 0x18b   : > { %3293 = vmatprep.mubr.msk.bf16.mxu1 %vm3912_vm0, %v3911_v0  ;;  %3278 = vmatpush3.bf16.msra.mxu1 %v3586_v45 }
 0x18c   : > { %3279 = vmatprep.subr.bf16.mxu1 %v3911_v0 }
 0x18f   : > { %3280 = vmatpush3.bf16.msra.mxu1 %v3587_v46 }
 0x190   : > { %3281 = vmatprep.subr.bf16.mxu1 %v3911_v0 }
 0x193   : > { %3282 = vmatpush3.bf16.msra.mxu1 %v3588_v48 }
 0x194   : > { %3283 = vmatprep.subr.bf16.mxu1 %v3911_v0 }
 0x197   : > { %3284 = vmatpush3.bf16.msra.mxu1 %v3589_v49 }
 0x198   : > { %3285 = vmatprep.subr.bf16.mxu1 %v3911_v0 }
 0x19b   : > { %3286 = vmatpush3.bf16.msra.mxu1 %v3590_v50 }
 0x19c   : > { %3287 = vmatprep.subr.bf16.mxu1 %v3911_v0 }
 0x19f   : > { %3288 = vmatpush3.bf16.msra.mxu1 %v3591_v52 }
 0x1a0   : > { %3289 = vmatprep.subr.bf16.mxu1 %v3911_v0 }
 0x1a3   : > { %3290 = vmatpush3.bf16.msra.mxu1 %v3592_v53 }
 0x1a4   : > { %3291 = vmatprep.subr.bf16.mxu1 %v3911_v0 }
 0x1a7   : > { %3292 = vmatpush3.bf16.msra.mxu1 %v3593_v54 }
 0x1a8   : > { %3317 = vmatprep.subr.bf16.mxu1 %v3911_v0 }
 0x25d   : > { %v842_v18 = vpop.f32.mrb[0].mxu1 }
 0x25e   : > { %v843_v19 = vadd.f32 %v2779_v17, %v842_v18  ;;  %v3255_v20 = vpop.f32.mrb[1].mxu1 }
 0x25f   : > { %v845_v21 = vpop.f32.mrb[2].mxu1  ;;  %v3594_v20 = vld [vmem:[%s4715_s9 + $0x40] sm:$0xff]  }
 0x260   : > { %v851_v22 = vand.u32 2147483647, %v843_v19  ;;  %v846_v23 = vadd.f32 %v2779_v17, %v845_v21  ;;  %v3256_v24 = vpop.f32.mrb[3].mxu1  ;;  %v849_v35 = vmax.f32 %v843_v19, 0.0  ;;  %v3595_v21 = vld [vmem:[%s4715_s9 + $0x48] sm:$0xff]  }
 0x261   : > { %v3598_v24 = vld [vmem:[%s4715_s9 + $0x60] sm:$0xff]  }
 0x262   : > { %v853_v25 = vsub.f32 0.0, %v851_v22  ;;  %v852_v26 = vand.u32 2147483647, %v846_v23  ;;  %v850_v39 = vmax.f32 %v846_v23, 0.0  ;;  %v3596_v22 = vld [vmem:[%s4715_s9 + $0x50] sm:$0xff]   ;;  %v3597_v23 = vld [vmem:[%s4715_s9 + $0x58] sm:$0xff]  }
 0x264   : > { %v855_v27 = vmul.f32 1.442695, %v853_v25  ;;  %v854_v28 = vsub.f32 0.0, %v852_v26  ;;  %v3599_v25 = vld [vmem:[%s4715_s9 + $0x68] sm:$0xff]   ;;  %v3600_v26 = vld [vmem:[%s4715_s9 + $0x70] sm:$0xff]  }
 0x266   : > { %3698 = vpow2.f32 %v855_v27  ;;  %v857_v29 = vmul.f32 1.442695, %v854_v28  ;;  %v3601_v27 = vld [vmem:[%s4715_s9 + $0x78] sm:$0xff]   ;;  %v2818_v28 = vld [vmem:[%s4714_s8 + $0x1] ss:$0 sm:$0xff] }
 0x268   : > { %3700 = vpow2.f32 %v857_v29 }
 0x270   : > { %v3699_v30 = vpop.eup %3698 }
 0x271   : > { %v859_v31 = vadd.f32 1.0, %v3699_v30 }
 0x272   : > { %v3701_v32 = vpop.eup %3700 }
 0x273   : > { %3702 = vlog2.f32 %v859_v31  ;;  %v860_v33 = vadd.f32 1.0, %v3701_v32 }
 0x275   : > { %3704 = vlog2.f32 %v860_v33 }
 0x27d   : > { %v3703_v34 = vpop.eup %3702 }
 0x27e   : > { %v862_v36 = vmul.f32 0.6931472, %v3703_v34 }
 0x27f   : > { %v3705_v37 = vpop.eup %3704 }
 0x280   : > { %v865_v38 = vadd.f32 %v862_v36, %v849_v35  ;;  %v864_v40 = vmul.f32 0.6931472, %v3705_v37 }
 0x282   : > { %v866_v41 = vadd.f32 %v864_v40, %v850_v39  ;;  %v2788_v42 = vadd.f32 -0.6931472, %v865_v38 }
 0x284   : > { %v2789_v43 = vadd.f32 -0.6931472, %v866_v41 }
 0x286   : > { %v885_v44 = vpack.c.bf16 %v2789_v43, %v2788_v42 }
 0x288   : > { %3274 = vmatmul.mubr.bf16.vlgmr.msra.gmra.mrb[4].mxu0 %v885_v44 }
 0x289   : > { %3313 = vmatprep.mubr.msk.bf16.mxu0 %vm3912_vm0, %v3911_v0  ;;  %3298 = vmatpush3.bf16.msra.mxu0 %v3594_v20 }
 0x28a   : > { %3299 = vmatprep.subr.bf16.mxu0 %v3911_v0 }
 0x28d   : > { %3300 = vmatpush3.bf16.msra.mxu0 %v3595_v21 }
 0x28e   : > { %3301 = vmatprep.subr.bf16.mxu0 %v3911_v0 }
 0x291   : > { %3302 = vmatpush3.bf16.msra.mxu0 %v3596_v22 }
 0x292   : > { %3303 = vmatprep.subr.bf16.mxu0 %v3911_v0 }
 0x295   : > { %3304 = vmatpush3.bf16.msra.mxu0 %v3597_v23 }
 0x296   : > { %3305 = vmatprep.subr.bf16.mxu0 %v3911_v0 }
 0x299   : > { %3306 = vmatpush3.bf16.msra.mxu0 %v3598_v24 }
 0x29a   : > { %3307 = vmatprep.subr.bf16.mxu0 %v3911_v0 }
 0x29d   : > { %3308 = vmatpush3.bf16.msra.mxu0 %v3599_v25 }
 0x29e   : > { %3309 = vmatprep.subr.bf16.mxu0 %v3911_v0 }
 0x2a1   : > { %3310 = vmatpush3.bf16.msra.mxu0 %v3600_v26 }
 0x2a2   : > { %3311 = vmatprep.subr.bf16.mxu0 %v3911_v0 }
 0x2a5   : > { %3312 = vmatpush3.bf16.msra.mxu0 %v3601_v27 }
 0x2a6   : > { %3337 = vmatprep.subr.bf16.mxu0 %v3911_v0 }
 0x35b   : > { %v975_v56 = vpop.f32.mrb[4].mxu0 }
 0x35c   : > { %v976_v57 = vadd.f32 %v2790_v55, %v975_v56  ;;  %v3275_v58 = vpop.f32.mrb[5].mxu0 }
 0x35d   : > { %v978_v59 = vpop.f32.mrb[6].mxu0  ;;  %v3602_v58 = vld [vmem:[%s4711_s5] sm:$0xff]  }
 0x35e   : > { %v4283_v60 = vadd.f32 %v976_v57, %v4203_v47  ;;  %v979_v61 = vadd.f32 %v2790_v55, %v978_v59  ;;  %v3276_v62 = vpop.f32.mrb[7].mxu0  ;;  %v3603_v59 = vld [vmem:[%s4711_s5 + $0x8] sm:$0xff]  }
 0x35f   : > { %v3605_v62 = vld [vmem:[%s4711_s5 + $0x18] sm:$0xff]  }
 0x360   : > { %v986_v63 = vand.u32 2147483647, %v4283_v60  ;;  %v4287_v1 = vadd.f32 %v979_v61, %v4206_v51  ;;  %v984_v11 = vmax.f32 %v4283_v60, 0.0  ;;  %v3604_v61 = vld [vmem:[%s4711_s5 + $0x10] sm:$0xff]  }
 0x362   : > { %v988_v2 = vsub.f32 0.0, %v986_v63  ;;  %v987_v3 = vand.u32 2147483647, %v4287_v1  ;;  %v985_v14 = vmax.f32 %v4287_v1, 0.0  ;;  %v3606_v63 = vld [vmem:[%s4711_s5 + $0x20] sm:$0xff]  }
 0x364   : > { %v990_v4 = vmul.f32 1.442695, %v988_v2  ;;  %v989_v5 = vsub.f32 0.0, %v987_v3  ;;  %v3607_v2 = vld [vmem:[%s4711_s5 + $0x28] sm:$0xff]   ;;  %v3608_v3 = vld [vmem:[%s4711_s5 + $0x30] sm:$0xff]  }
 0x366   : > { %3706 = vpow2.f32 %v990_v4  ;;  %v992_v6 = vmul.f32 1.442695, %v989_v5  ;;  %v3609_v4 = vld [vmem:[%s4711_s5 + $0x38] sm:$0xff]   ;;  %v2845_v5 = vld [vmem:[#allocation4 + $0x1] ss:$0 sm:$0xff] }
 0x368   : > { %3708 = vpow2.f32 %v992_v6 }
 0x370   : > { %v3707_v7 = vpop.eup %3706 }
 0x371   : > { %v994_v8 = vadd.f32 1.0, %v3707_v7 }
 0x372   : > { %v3709_v9 = vpop.eup %3708 }
 0x373   : > { %3710 = vlog2.f32 %v994_v8  ;;  %v995_v47 = vadd.f32 1.0, %v3709_v9 }
 0x375   : > { %3712 = vlog2.f32 %v995_v47 }
 0x37d   : > { %v3711_v10 = vpop.eup %3710 }
 0x37e   : > { %v997_v12 = vmul.f32 0.6931472, %v3711_v10 }
 0x37f   : > { %v3713_v51 = vpop.eup %3712 }
 0x380   : > { %v1000_v13 = vadd.f32 %v997_v12, %v984_v11  ;;  %v999_v15 = vmul.f32 0.6931472, %v3713_v51 }
 0x382   : > { %v1001_v16 = vadd.f32 %v999_v15, %v985_v14  ;;  %v2799_v17 = vadd.f32 -0.6931472, %v1000_v13 }
 0x384   : > { %v2800_v18 = vadd.f32 -0.6931472, %v1001_v16 }
 0x386   : > { %v1021_v19 = vpack.c.bf16 %v2800_v18, %v2799_v17 }
 0x388   : > { %3294 = vmatmul.mubr.bf16.vlgmr.msra.gmra.mrb[4].mxu1 %v1021_v19 }
 0x389   : > { %3333 = vmatprep.mubr.msk.bf16.mxu1 %vm3912_vm0, %v3911_v0  ;;  %3318 = vmatpush3.bf16.msra.mxu1 %v3602_v58 }
 0x38a   : > { %3319 = vmatprep.subr.bf16.mxu1 %v3911_v0 }
 0x38d   : > { %3320 = vmatpush3.bf16.msra.mxu1 %v3603_v59 }
 0x38e   : > { %3321 = vmatprep.subr.bf16.mxu1 %v3911_v0 }
 0x391   : > { %3322 = vmatpush3.bf16.msra.mxu1 %v3604_v61 }
 0x392   : > { %3323 = vmatprep.subr.bf16.mxu1 %v3911_v0 }
 0x395   : > { %3324 = vmatpush3.bf16.msra.mxu1 %v3605_v62 }
 0x396   : > { %3325 = vmatprep.subr.bf16.mxu1 %v3911_v0 }
 0x399   : > { %3326 = vmatpush3.bf16.msra.mxu1 %v3606_v63 }
 0x39a   : > { %3327 = vmatprep.subr.bf16.mxu1 %v3911_v0 }
 0x39d   : > { %3328 = vmatpush3.bf16.msra.mxu1 %v3607_v2 }
 0x39e   : > { %3329 = vmatprep.subr.bf16.mxu1 %v3911_v0 }
 0x3a1   : > { %3330 = vmatpush3.bf16.msra.mxu1 %v3608_v3 }
 0x3a2   : > { %3331 = vmatprep.subr.bf16.mxu1 %v3911_v0 }
 0x3a5   : > { %3332 = vmatpush3.bf16.msra.mxu1 %v3609_v4 }
 0x3a6   : > { %3357 = vmatprep.subr.bf16.mxu1 %v3911_v0 }
 0x45b   : > { %v1112_v29 = vpop.f32.mrb[4].mxu1 }
 0x45c   : > { %v1113_v30 = vadd.f32 %v2818_v28, %v1112_v29  ;;  %v3295_v31 = vpop.f32.mrb[5].mxu1 }
 0x45d   : > { %v1115_v32 = vpop.f32.mrb[6].mxu1  ;;  %v3610_v31 = vld [vmem:[%s4713_s7 + $0x80] sm:$0xff]  }
 0x45e   : > { %v1121_v33 = vand.u32 2147483647, %v1113_v30  ;;  %v1116_v34 = vadd.f32 %v2818_v28, %v1115_v32  ;;  %v3296_v35 = vpop.f32.mrb[7].mxu1  ;;  %v1119_v46 = vmax.f32 %v1113_v30, 0.0  ;;  %v3611_v32 = vld [vmem:[%s4713_s7 + $0x88] sm:$0xff]  }
 0x45f   : > { %v3614_v35 = vld [vmem:[%s4713_s7 + $0xa0] sm:$0xff]  }
 0x460   : > { %v1123_v36 = vsub.f32 0.0, %v1121_v33  ;;  %v1122_v37 = vand.u32 2147483647, %v1116_v34  ;;  %v1120_v52 = vmax.f32 %v1116_v34, 0.0  ;;  %v3612_v33 = vld [vmem:[%s4713_s7 + $0x90] sm:$0xff]   ;;  %v3613_v34 = vld [vmem:[%s4713_s7 + $0x98] sm:$0xff]  }
 0x462   : > { %v1125_v38 = vmul.f32 1.442695, %v1123_v36  ;;  %v1124_v39 = vsub.f32 0.0, %v1122_v37  ;;  %v3615_v36 = vld [vmem:[%s4713_s7 + $0xa8] sm:$0xff]   ;;  %v3616_v37 = vld [vmem:[%s4713_s7 + $0xb0] sm:$0xff]  }
 0x464   : > { %3714 = vpow2.f32 %v1125_v38  ;;  %v1127_v40 = vmul.f32 1.442695, %v1124_v39  ;;  %v3617_v38 = vld [vmem:[%s4713_s7 + $0xb8] sm:$0xff]   ;;  %v2865_v39 = vld [vmem:[#allocation2] ss:$0 sm:$0xff] }
 0x466   : > { %3716 = vpow2.f32 %v1127_v40  ;;  %v2856_v40 = vld [vmem:[%s4712_s6] ss:$0 sm:$0xff] }
 0x46e   : > { %v3715_v41 = vpop.eup %3714 }
 0x46f   : > { %v1129_v42 = vadd.f32 1.0, %v3715_v41  ;;  %v3802_v41 = vld [vmem:[%s4133_s17] sm:$0xff] }
 0x470   : > { %v3717_v43 = vpop.eup %3716 }
 0x471   : > { %3718 = vlog2.f32 %v1129_v42  ;;  %v1130_v44 = vadd.f32 1.0, %v3717_v43  ;;  %v1396_v42 = vmul.f32 %v3802_v41, %v2865_v39 }
 0x473   : > { %3720 = vlog2.f32 %v1130_v44 }
 0x47b   : > { %v3719_v45 = vpop.eup %3718 }
 0x47c   : > { %v1132_v48 = vmul.f32 0.6931472, %v3719_v45 }
 0x47d   : > { %v3721_v49 = vpop.eup %3720 }
 0x47e   : > { %v1135_v50 = vadd.f32 %v1132_v48, %v1119_v46  ;;  %v1134_v53 = vmul.f32 0.6931472, %v3721_v49  ;;  %v3803_v46 = vld [vmem:[%s4133_s17 + $0x8] sm:$0xff] }
 0x47f   : > { %v1397_v48 = vmul.f32 %v3803_v46, %v2865_v39 }
 0x480   : > { %v1136_v54 = vadd.f32 %v1134_v53, %v1120_v52  ;;  %v2827_v55 = vadd.f32 -0.6931472, %v1135_v50 }
 0x482   : > { %v2828_v56 = vadd.f32 -0.6931472, %v1136_v54 }
 0x484   : > { %v1156_v57 = vpack.c.bf16 %v2828_v56, %v2827_v55 }
 0x486   : > { %3314 = vmatmul.mubr.bf16.vlgmr.msra.gmra.mrb[8].mxu0 %v1156_v57 }
 0x487   : > { %3353 = vmatprep.mubr.msk.bf16.mxu0 %vm3912_vm0, %v3911_v0  ;;  %3338 = vmatpush3.bf16.msra.mxu0 %v3610_v31 }
 0x488   : > { %3339 = vmatprep.subr.bf16.mxu0 %v3911_v0 }
 0x48b   : > { %3340 = vmatpush3.bf16.msra.mxu0 %v3611_v32 }
 0x48c   : > { %3341 = vmatprep.subr.bf16.mxu0 %v3911_v0 }
 0x48f   : > { %3342 = vmatpush3.bf16.msra.mxu0 %v3612_v33 }
 0x490   : > { %3343 = vmatprep.subr.bf16.mxu0 %v3911_v0 }
 0x493   : > { %3344 = vmatpush3.bf16.msra.mxu0 %v3613_v34 }
 0x494   : > { %3345 = vmatprep.subr.bf16.mxu0 %v3911_v0 }
 0x497   : > { %3346 = vmatpush3.bf16.msra.mxu0 %v3614_v35 }
 0x498   : > { %3347 = vmatprep.subr.bf16.mxu0 %v3911_v0 }
 0x49b   : > { %3348 = vmatpush3.bf16.msra.mxu0 %v3615_v36 }
 0x49c   : > { %3349 = vmatprep.subr.bf16.mxu0 %v3911_v0 }
 0x49f   : > { %3350 = vmatpush3.bf16.msra.mxu0 %v3616_v37 }
 0x4a0   : > { %3351 = vmatprep.subr.bf16.mxu0 %v3911_v0 }
 0x4a3   : > { %3352 = vmatpush3.bf16.msra.mxu0 %v3617_v38 }
 0x4a4   : > { %3377 = vmatprep.subr.bf16.mxu0 %v3911_v0 }
 0x559   : > { %v1247_v6 = vpop.f32.mrb[8].mxu0 }
 0x55a   : > { %v1248_v7 = vadd.f32 %v2845_v5, %v1247_v6  ;;  %v3315_v8 = vpop.f32.mrb[9].mxu0 }
 0x55b   : > { %v1250_v9 = vpop.f32.mrb[10].mxu0 }
 0x55c   : > { %v1254_v47 = vadd.f32 %v1248_v7, %v4283_v60  ;;  %v1251_v10 = vadd.f32 %v2845_v5, %v1250_v9  ;;  %v3316_v11 = vpop.f32.mrb[11].mxu0 }
 0x55e   : > { %v1258_v12 = vand.u32 2147483647, %v1254_v47  ;;  %v1255_v51 = vadd.f32 %v1251_v10, %v4287_v1  ;;  %v1256_v60 = vmax.f32 %v1254_v47, 0.0 }
 0x560   : > { %v1260_v13 = vsub.f32 0.0, %v1258_v12  ;;  %v1259_v14 = vand.u32 2147483647, %v1255_v51  ;;  %v1257_v26 = vmax.f32 %v1255_v51, 0.0 }
 0x562   : > { %v1262_v15 = vmul.f32 1.442695, %v1260_v13  ;;  %v1261_v16 = vsub.f32 0.0, %v1259_v14  ;;  %v3618_v13 = vld [vmem:[%s4715_s9 + $0x80] sm:$0xff]   ;;  %v3619_v14 = vld [vmem:[%s4715_s9 + $0x88] sm:$0xff]  }
 0x564   : > { %3722 = vpow2.f32 %v1262_v15  ;;  %v1264_v17 = vmul.f32 1.442695, %v1261_v16  ;;  %v3620_v15 = vld [vmem:[%s4715_s9 + $0x90] sm:$0xff]   ;;  %v3621_v16 = vld [vmem:[%s4715_s9 + $0x98] sm:$0xff]  }
 0x566   : > { %3724 = vpow2.f32 %v1264_v17  ;;  %v3622_v17 = vld [vmem:[%s4715_s9 + $0xa0] sm:$0xff]  }
 0x56e   : > { %v3723_v18 = vpop.eup %3722 }
 0x56f   : > { %v1266_v19 = vadd.f32 1.0, %v3723_v18  ;;  %v3623_v18 = vld [vmem:[%s4715_s9 + $0xa8] sm:$0xff]  }
 0x570   : > { %v3725_v20 = vpop.eup %3724 }
 0x571   : > { %3726 = vlog2.f32 %v1266_v19  ;;  %v1267_v21 = vadd.f32 1.0, %v3725_v20  ;;  %v3624_v19 = vld [vmem:[%s4715_s9 + $0xb0] sm:$0xff]   ;;  %v3625_v20 = vld [vmem:[%s4715_s9 + $0xb8] sm:$0xff]  }
 0x573   : > { %3728 = vlog2.f32 %v1267_v21  ;;  %v2885_v21 = vld [vmem:[%s4714_s8 + $0x2] ss:$0 sm:$0xff] }
 0x57b   : > { %v3727_v22 = vpop.eup %3726 }
 0x57c   : > { %v1269_v23 = vmul.f32 0.6931472, %v3727_v22 }
 0x57d   : > { %v3729_v24 = vpop.eup %3728 }
 0x57e   : > { %v1272_v25 = vadd.f32 %v1269_v23, %v1256_v60  ;;  %v1271_v1 = vmul.f32 0.6931472, %v3729_v24 }
 0x580   : > { %v1273_v27 = vadd.f32 %v1271_v1, %v1257_v26  ;;  %v2854_v28 = vadd.f32 -0.6931472, %v1272_v25 }
 0x582   : > { %v2855_v29 = vadd.f32 -0.6931472, %v1273_v27 }
 0x584   : > { %v1292_v30 = vpack.c.bf16 %v2855_v29, %v2854_v28 }
 0x586   : > { %3334 = vmatmul.mubr.bf16.vlgmr.msra.gmra.mrb[8].mxu1 %v1292_v30 }
 0x587   : > { %3373 = vmatprep.mubr.msk.bf16.mxu1 %vm3912_vm0, %v3911_v0  ;;  %3358 = vmatpush3.bf16.msra.mxu1 %v3618_v13 }
 0x588   : > { %3359 = vmatprep.subr.bf16.mxu1 %v3911_v0 }
 0x58b   : > { %3360 = vmatpush3.bf16.msra.mxu1 %v3619_v14 }
 0x58c   : > { %3361 = vmatprep.subr.bf16.mxu1 %v3911_v0 }
 0x58f   : > { %3362 = vmatpush3.bf16.msra.mxu1 %v3620_v15 }
 0x590   : > { %3363 = vmatprep.subr.bf16.mxu1 %v3911_v0 }
 0x593   : > { %3364 = vmatpush3.bf16.msra.mxu1 %v3621_v16 }
 0x594   : > { %3365 = vmatprep.subr.bf16.mxu1 %v3911_v0 }
 0x597   : > { %3366 = vmatpush3.bf16.msra.mxu1 %v3622_v17 }
 0x598   : > { %3367 = vmatprep.subr.bf16.mxu1 %v3911_v0 }
 0x59b   : > { %3368 = vmatpush3.bf16.msra.mxu1 %v3623_v18 }
 0x59c   : > { %3369 = vmatprep.subr.bf16.mxu1 %v3911_v0 }
 0x59f   : > { %3370 = vmatpush3.bf16.msra.mxu1 %v3624_v19 }
 0x5a0   : > { %3371 = vmatprep.subr.bf16.mxu1 %v3911_v0 }
 0x5a3   : > { %3372 = vmatpush3.bf16.msra.mxu1 %v3625_v20 }
 0x5a4   : > { %3397 = vmatprep.subr.bf16.mxu1 %v3911_v0 }
 0x659   : > { %v1382_v43 = vpop.f32.mrb[8].mxu1 }
 0x65a   : > { %v1383_v44 = vadd.f32 %v2856_v40, %v1382_v43  ;;  %v3335_v45 = vpop.f32.mrb[9].mxu1 }
 0x65b   : > { %v1385_v49 = vpop.f32.mrb[10].mxu1 }
 0x65c   : > { %v4404_v50 = vadd.f32 %v1396_v42, %v1383_v44  ;;  %v1386_v52 = vadd.f32 %v2856_v40, %v1385_v49  ;;  %v3336_v53 = vpop.f32.mrb[11].mxu1  ;;  %v3627_v49 = vld [vmem:[%s4713_s7 + $0xc8] sm:$0xff]  }
 0x65d   : > { %v3629_v53 = vld [vmem:[%s4713_s7 + $0xd8] sm:$0xff]  }
 0x65e   : > { %v1402_v54 = vand.u32 2147483647, %v4404_v50  ;;  %v4407_v55 = vadd.f32 %v1397_v48, %v1386_v52  ;;  %v1400_v5 = vmax.f32 %v4404_v50, 0.0  ;;  %v3626_v48 = vld [vmem:[%s4713_s7 + $0xc0] sm:$0xff]   ;;  %v3628_v52 = vld [vmem:[%s4713_s7 + $0xd0] sm:$0xff]  }
 0x660   : > { %v1404_v56 = vsub.f32 0.0, %v1402_v54  ;;  %v1403_v57 = vand.u32 2147483647, %v4407_v55  ;;  %v1401_v9 = vmax.f32 %v4407_v55, 0.0  ;;  %v3630_v54 = vld [vmem:[%s4713_s7 + $0xe0] sm:$0xff]  }
 0x662   : > { %v1406_v58 = vmul.f32 1.442695, %v1404_v56  ;;  %v1405_v59 = vsub.f32 0.0, %v1403_v57  ;;  %v3631_v56 = vld [vmem:[%s4713_s7 + $0xe8] sm:$0xff]   ;;  %v3632_v57 = vld [vmem:[%s4713_s7 + $0xf0] sm:$0xff]  }
 0x664   : > { %3730 = vpow2.f32 %v1406_v58  ;;  %v1408_v61 = vmul.f32 1.442695, %v1405_v59  ;;  %v3633_v58 = vld [vmem:[%s4713_s7 + $0xf8] sm:$0xff]   ;;  %v2912_v59 = vld [vmem:[#allocation4 + $0x2] ss:$0 sm:$0xff] }
 0x666   : > { %3732 = vpow2.f32 %v1408_v61 }
 0x66e   : > { %v3731_v62 = vpop.eup %3730 }
 0x66f   : > { %v1410_v63 = vadd.f32 1.0, %v3731_v62 }
 0x670   : > { %v3733_v2 = vpop.eup %3732 }
 0x671   : > { %3734 = vlog2.f32 %v1410_v63  ;;  %v1411_v3 = vadd.f32 1.0, %v3733_v2 }
 0x673   : > { %3736 = vlog2.f32 %v1411_v3 }
 0x67b   : > { %v3735_v4 = vpop.eup %3734 }
 0x67c   : > { %v1413_v6 = vmul.f32 0.6931472, %v3735_v4 }
 0x67d   : > { %v3737_v7 = vpop.eup %3736 }
 0x67e   : > { %v1416_v8 = vadd.f32 %v1413_v6, %v1400_v5  ;;  %v1415_v47 = vmul.f32 0.6931472, %v3737_v7 }
 0x680   : > { %v1417_v10 = vadd.f32 %v1415_v47, %v1401_v9  ;;  %v2866_v11 = vadd.f32 -0.6931472, %v1416_v8 }
 0x682   : > { %v2867_v12 = vadd.f32 -0.6931472, %v1417_v10 }
 0x684   : > { %v1437_v51 = vpack.c.bf16 %v2867_v12, %v2866_v11 }
 0x686   : > { %3354 = vmatmul.mubr.bf16.vlgmr.msra.gmra.mrb[12].mxu0 %v1437_v51 }
 0x687   : > { %3393 = vmatprep.mubr.msk.bf16.mxu0 %vm3912_vm0, %v3911_v0  ;;  %3378 = vmatpush3.bf16.msra.mxu0 %v3626_v48 }
 0x688   : > { %3379 = vmatprep.subr.bf16.mxu0 %v3911_v0 }
 0x68b   : > { %3380 = vmatpush3.bf16.msra.mxu0 %v3627_v49 }
 0x68c   : > { %3381 = vmatprep.subr.bf16.mxu0 %v3911_v0 }
 0x68f   : > { %3382 = vmatpush3.bf16.msra.mxu0 %v3628_v52 }
 0x690   : > { %3383 = vmatprep.subr.bf16.mxu0 %v3911_v0 }
 0x693   : > { %3384 = vmatpush3.bf16.msra.mxu0 %v3629_v53 }
 0x694   : > { %3385 = vmatprep.subr.bf16.mxu0 %v3911_v0 }
 0x697   : > { %3386 = vmatpush3.bf16.msra.mxu0 %v3630_v54 }
 0x698   : > { %3387 = vmatprep.subr.bf16.mxu0 %v3911_v0 }
 0x69b   : > { %3388 = vmatpush3.bf16.msra.mxu0 %v3631_v56 }
 0x69c   : > { %3389 = vmatprep.subr.bf16.mxu0 %v3911_v0 }
 0x69f   : > { %3390 = vmatpush3.bf16.msra.mxu0 %v3632_v57 }
 0x6a0   : > { %3391 = vmatprep.subr.bf16.mxu0 %v3911_v0 }
 0x6a3   : > { %3392 = vmatpush3.bf16.msra.mxu0 %v3633_v58 }
 0x6a4   : > { %3417 = vmatprep.subr.bf16.mxu0 %v3911_v0 }
 0x759   : > { %v1528_v22 = vpop.f32.mrb[12].mxu0 }
 0x75a   : > { %v1529_v60 = vadd.f32 %v2885_v21, %v1528_v22  ;;  %v3355_v23 = vpop.f32.mrb[13].mxu0 }
 0x75b   : > { %v1531_v24 = vpop.f32.mrb[14].mxu0  ;;  %v3634_v23 = vld [vmem:[%s4715_s9 + $0xc0] sm:$0xff]  }
 0x75c   : > { %v1537_v25 = vand.u32 2147483647, %v1529_v60  ;;  %v1532_v26 = vadd.f32 %v2885_v21, %v1531_v24  ;;  %v3356_v1 = vpop.f32.mrb[15].mxu0  ;;  %v1535_v37 = vmax.f32 %v1529_v60, 0.0  ;;  %v3635_v24 = vld [vmem:[%s4715_s9 + $0xc8] sm:$0xff]  }
 0x75d   : > { %v3638_v1 = vld [vmem:[%s4715_s9 + $0xe0] sm:$0xff]  }
 0x75e   : > { %v1539_v27 = vsub.f32 0.0, %v1537_v25  ;;  %v1538_v28 = vand.u32 2147483647, %v1532_v26  ;;  %v1536_v41 = vmax.f32 %v1532_v26, 0.0  ;;  %v3636_v25 = vld [vmem:[%s4715_s9 + $0xd0] sm:$0xff]   ;;  %v3637_v26 = vld [vmem:[%s4715_s9 + $0xd8] sm:$0xff]  }
 0x760   : > { %v1541_v29 = vmul.f32 1.442695, %v1539_v27  ;;  %v1540_v30 = vsub.f32 0.0, %v1538_v28  ;;  %v3639_v27 = vld [vmem:[%s4715_s9 + $0xe8] sm:$0xff]   ;;  %v3640_v28 = vld [vmem:[%s4715_s9 + $0xf0] sm:$0xff]  }
 0x762   : > { %3738 = vpow2.f32 %v1541_v29  ;;  %v1543_v31 = vmul.f32 1.442695, %v1540_v30  ;;  %v3641_v29 = vld [vmem:[%s4715_s9 + $0xf8] sm:$0xff]   ;;  %v2940_v30 = vld [vmem:[%s4714_s8 + $0x3] ss:$0 sm:$0xff] }
 0x764   : > { %3740 = vpow2.f32 %v1543_v31 }
 0x76c   : > { %v3739_v32 = vpop.eup %3738 }
 0x76d   : > { %v1545_v33 = vadd.f32 1.0, %v3739_v32 }
 0x76e   : > { %v3741_v34 = vpop.eup %3740 }
 0x76f   : > { %3742 = vlog2.f32 %v1545_v33  ;;  %v1546_v35 = vadd.f32 1.0, %v3741_v34 }
 0x771   : > { %3744 = vlog2.f32 %v1546_v35 }
 0x779   : > { %v3743_v36 = vpop.eup %3742 }
 0x77a   : > { %v1548_v38 = vmul.f32 0.6931472, %v3743_v36 }
 0x77b   : > { %v3745_v39 = vpop.eup %3744 }
 0x77c   : > { %v1551_v40 = vadd.f32 %v1548_v38, %v1535_v37  ;;  %v1550_v42 = vmul.f32 0.6931472, %v3745_v39 }
 0x77e   : > { %v1552_v43 = vadd.f32 %v1550_v42, %v1536_v41  ;;  %v2894_v44 = vadd.f32 -0.6931472, %v1551_v40 }
 0x780   : > { %v2895_v45 = vadd.f32 -0.6931472, %v1552_v43 }
 0x782   : > { %v1572_v46 = vpack.c.bf16 %v2895_v45, %v2894_v44 }
 0x784   : > { %3374 = vmatmul.mubr.bf16.vlgmr.msra.gmra.mrb[12].mxu1 %v1572_v46 }
 0x785   : > { %3413 = vmatprep.mubr.msk.bf16.mxu1 %vm3912_vm0, %v3911_v0  ;;  %3398 = vmatpush3.bf16.msra.mxu1 %v3634_v23 }
 0x786   : > { %3399 = vmatprep.subr.bf16.mxu1 %v3911_v0 }
 0x789   : > { %3400 = vmatpush3.bf16.msra.mxu1 %v3635_v24 }
 0x78a   : > { %3401 = vmatprep.subr.bf16.mxu1 %v3911_v0 }
 0x78d   : > { %3402 = vmatpush3.bf16.msra.mxu1 %v3636_v25 }
 0x78e   : > { %3403 = vmatprep.subr.bf16.mxu1 %v3911_v0 }
 0x791   : > { %3404 = vmatpush3.bf16.msra.mxu1 %v3637_v26 }
 0x792   : > { %3405 = vmatprep.subr.bf16.mxu1 %v3911_v0 }
 0x795   : > { %3406 = vmatpush3.bf16.msra.mxu1 %v3638_v1 }
 0x796   : > { %3407 = vmatprep.subr.bf16.mxu1 %v3911_v0 }
 0x799   : > { %3408 = vmatpush3.bf16.msra.mxu1 %v3639_v27 }
 0x79a   : > { %3409 = vmatprep.subr.bf16.mxu1 %v3911_v0 }
 0x79d   : > { %3410 = vmatpush3.bf16.msra.mxu1 %v3640_v28 }
 0x79e   : > { %3411 = vmatprep.subr.bf16.mxu1 %v3911_v0 }
 0x7a1   : > { %3412 = vmatpush3.bf16.msra.mxu1 %v3641_v29 }
 0x7a2   : > { %3437 = vmatprep.subr.bf16.mxu1 %v3911_v0 }
 0x857   : > { %v1663_v61 = vpop.f32.mrb[12].mxu1 }
 0x858   : > { %v1664_v62 = vadd.f32 %v2912_v59, %v1663_v61  ;;  %v3375_v63 = vpop.f32.mrb[13].mxu1 }
 0x859   : > { %v1666_v2 = vpop.f32.mrb[14].mxu1  ;;  %v3642_v63 = vld [vmem:[%s4713_s7 + $0x100] sm:$0xff]  }
 0x85a   : > { %v4484_v3 = vadd.f32 %v1664_v62, %v4404_v50  ;;  %v1667_v4 = vadd.f32 %v2912_v59, %v1666_v2  ;;  %v3376_v5 = vpop.f32.mrb[15].mxu1  ;;  %v3643_v2 = vld [vmem:[%s4713_s7 + $0x108] sm:$0xff]  }
 0x85b   : > { %v3645_v5 = vld [vmem:[%s4713_s7 + $0x118] sm:$0xff]  }
 0x85c   : > { %v1674_v6 = vand.u32 2147483647, %v4484_v3  ;;  %v4488_v7 = vadd.f32 %v1667_v4, %v4407_v55  ;;  %v1672_v15 = vmax.f32 %v4484_v3, 0.0  ;;  %v3644_v4 = vld [vmem:[%s4713_s7 + $0x110] sm:$0xff]  }
 0x85e   : > { %v1676_v8 = vsub.f32 0.0, %v1674_v6  ;;  %v1675_v9 = vand.u32 2147483647, %v4488_v7  ;;  %v1673_v18 = vmax.f32 %v4488_v7, 0.0  ;;  %v3646_v6 = vld [vmem:[%s4713_s7 + $0x120] sm:$0xff]  }
 0x860   : > { %v1678_v47 = vmul.f32 1.442695, %v1676_v8  ;;  %v1677_v10 = vsub.f32 0.0, %v1675_v9  ;;  %v3647_v8 = vld [vmem:[%s4713_s7 + $0x128] sm:$0xff]   ;;  %v3648_v9 = vld [vmem:[%s4713_s7 + $0x130] sm:$0xff]  }
 0x862   : > { %3746 = vpow2.f32 %v1678_v47  ;;  %v1680_v11 = vmul.f32 1.442695, %v1677_v10  ;;  %v3649_v47 = vld [vmem:[%s4713_s7 + $0x138] sm:$0xff]   ;;  %v2967_v10 = vld [vmem:[#allocation4 + $0x3] ss:$0 sm:$0xff] }
 0x864   : > { %3748 = vpow2.f32 %v1680_v11 }
 0x86c   : > { %v3747_v12 = vpop.eup %3746 }
 0x86d   : > { %v1682_v51 = vadd.f32 1.0, %v3747_v12 }
 0x86e   : > { %v3749_v13 = vpop.eup %3748 }
 0x86f   : > { %3750 = vlog2.f32 %v1682_v51  ;;  %v1683_v50 = vadd.f32 1.0, %v3749_v13 }
 0x871   : > { %3752 = vlog2.f32 %v1683_v50 }
 0x879   : > { %v3751_v14 = vpop.eup %3750 }
 0x87a   : > { %v1685_v16 = vmul.f32 0.6931472, %v3751_v14 }
 0x87b   : > { %v3753_v55 = vpop.eup %3752 }
 0x87c   : > { %v1688_v17 = vadd.f32 %v1685_v16, %v1672_v15  ;;  %v1687_v19 = vmul.f32 0.6931472, %v3753_v55 }
 0x87e   : > { %v1689_v20 = vadd.f32 %v1687_v19, %v1673_v18  ;;  %v2921_v21 = vadd.f32 -0.6931472, %v1688_v17 }
 0x880   : > { %v2922_v22 = vadd.f32 -0.6931472, %v1689_v20 }
 0x882   : > { %v1709_v60 = vpack.c.bf16 %v2922_v22, %v2921_v21 }
 0x884   : > { %3394 = vmatmul.mubr.bf16.vlgmr.msra.gmra.mrb[16].mxu0 %v1709_v60 }
 0x885   : > { %3433 = vmatprep.mubr.msk.bf16.mxu0 %vm3912_vm0, %v3911_v0  ;;  %3418 = vmatpush3.bf16.msra.mxu0 %v3642_v63 }
 0x886   : > { %3419 = vmatprep.subr.bf16.mxu0 %v3911_v0 }
 0x889   : > { %3420 = vmatpush3.bf16.msra.mxu0 %v3643_v2 }
 0x88a   : > { %3421 = vmatprep.subr.bf16.mxu0 %v3911_v0 }
 0x88d   : > { %3422 = vmatpush3.bf16.msra.mxu0 %v3644_v4 }
 0x88e   : > { %3423 = vmatprep.subr.bf16.mxu0 %v3911_v0 }
 0x891   : > { %3424 = vmatpush3.bf16.msra.mxu0 %v3645_v5 }
 0x892   : > { %3425 = vmatprep.subr.bf16.mxu0 %v3911_v0 }
 0x895   : > { %3426 = vmatpush3.bf16.msra.mxu0 %v3646_v6 }
 0x896   : > { %3427 = vmatprep.subr.bf16.mxu0 %v3911_v0 }
 0x899   : > { %3428 = vmatpush3.bf16.msra.mxu0 %v3647_v8 }
 0x89a   : > { %3429 = vmatprep.subr.bf16.mxu0 %v3911_v0 }
 0x89d   : > { %3430 = vmatpush3.bf16.msra.mxu0 %v3648_v9 }
 0x89e   : > { %3431 = vmatprep.subr.bf16.mxu0 %v3911_v0 }
 0x8a1   : > { %3432 = vmatpush3.bf16.msra.mxu0 %v3649_v47 }
 0x8a2   : > { %3457 = vmatprep.subr.bf16.mxu0 %v3911_v0 }
 0x957   : > { %v1800_v31 = vpop.f32.mrb[16].mxu0 }
 0x958   : > { %v1801_v32 = vadd.f32 %v2940_v30, %v1800_v31  ;;  %v3395_v33 = vpop.f32.mrb[17].mxu0 }
 0x959   : > { %v1803_v34 = vpop.f32.mrb[18].mxu0  ;;  %v3650_v33 = vld [vmem:[%s4715_s9 + $0x100] sm:$0xff]  }
 0x95a   : > { %v1809_v35 = vand.u32 2147483647, %v1801_v32  ;;  %v1804_v36 = vadd.f32 %v2940_v30, %v1803_v34  ;;  %v3396_v37 = vpop.f32.mrb[19].mxu0  ;;  %v1807_v49 = vmax.f32 %v1801_v32, 0.0  ;;  %v3651_v34 = vld [vmem:[%s4715_s9 + $0x108] sm:$0xff]  }
 0x95b   : > { %v3654_v37 = vld [vmem:[%s4715_s9 + $0x120] sm:$0xff]  }
 0x95c   : > { %v1811_v38 = vsub.f32 0.0, %v1809_v35  ;;  %v1810_v39 = vand.u32 2147483647, %v1804_v36  ;;  %v1808_v56 = vmax.f32 %v1804_v36, 0.0  ;;  %v3652_v35 = vld [vmem:[%s4715_s9 + $0x110] sm:$0xff]   ;;  %v3653_v36 = vld [vmem:[%s4715_s9 + $0x118] sm:$0xff]  }
 0x95e   : > { %v1813_v40 = vmul.f32 1.442695, %v1811_v38  ;;  %v1812_v41 = vsub.f32 0.0, %v1810_v39  ;;  %v3655_v38 = vld [vmem:[%s4715_s9 + $0x128] sm:$0xff]   ;;  %v3656_v39 = vld [vmem:[%s4715_s9 + $0x130] sm:$0xff]  }
 0x960   : > { %3754 = vpow2.f32 %v1813_v40  ;;  %v1815_v42 = vmul.f32 1.442695, %v1812_v41  ;;  %v3657_v40 = vld [vmem:[%s4715_s9 + $0x138] sm:$0xff]   ;;  %v2995_v41 = vld [vmem:[%s4714_s8 + $0x4] ss:$0 sm:$0xff] }
 0x962   : > { %3756 = vpow2.f32 %v1815_v42 }
 0x96a   : > { %v3755_v43 = vpop.eup %3754 }
 0x96b   : > { %v1817_v44 = vadd.f32 1.0, %v3755_v43 }
 0x96c   : > { %v3757_v45 = vpop.eup %3756 }
 0x96d   : > { %3758 = vlog2.f32 %v1817_v44  ;;  %v1818_v46 = vadd.f32 1.0, %v3757_v45 }
 0x96f   : > { %3760 = vlog2.f32 %v1818_v46 }
 0x977   : > { %v3759_v48 = vpop.eup %3758 }
 0x978   : > { %v1820_v52 = vmul.f32 0.6931472, %v3759_v48 }
 0x979   : > { %v3761_v53 = vpop.eup %3760 }
 0x97a   : > { %v1823_v54 = vadd.f32 %v1820_v52, %v1807_v49  ;;  %v1822_v57 = vmul.f32 0.6931472, %v3761_v53 }
 0x97c   : > { %v1824_v58 = vadd.f32 %v1822_v57, %v1808_v56  ;;  %v2949_v59 = vadd.f32 -0.6931472, %v1823_v54 }
 0x97e   : > { %v2950_v61 = vadd.f32 -0.6931472, %v1824_v58 }
 0x980   : > { %v1844_v62 = vpack.c.bf16 %v2950_v61, %v2949_v59 }
 0x982   : > { %3414 = vmatmul.mubr.bf16.vlgmr.msra.gmra.mrb[16].mxu1 %v1844_v62 }
 0x983   : > { %3453 = vmatprep.mubr.msk.bf16.mxu1 %vm3912_vm0, %v3911_v0  ;;  %3438 = vmatpush3.bf16.msra.mxu1 %v3650_v33 }
 0x984   : > { %3439 = vmatprep.subr.bf16.mxu1 %v3911_v0 }
 0x987   : > { %3440 = vmatpush3.bf16.msra.mxu1 %v3651_v34 }
 0x988   : > { %3441 = vmatprep.subr.bf16.mxu1 %v3911_v0 }
 0x98b   : > { %3442 = vmatpush3.bf16.msra.mxu1 %v3652_v35 }
 0x98c   : > { %3443 = vmatprep.subr.bf16.mxu1 %v3911_v0 }
 0x98f   : > { %3444 = vmatpush3.bf16.msra.mxu1 %v3653_v36 }
 0x990   : > { %3445 = vmatprep.subr.bf16.mxu1 %v3911_v0 }
 0x993   : > { %3446 = vmatpush3.bf16.msra.mxu1 %v3654_v37 }
 0x994   : > { %3447 = vmatprep.subr.bf16.mxu1 %v3911_v0 }
 0x997   : > { %3448 = vmatpush3.bf16.msra.mxu1 %v3655_v38 }
 0x998   : > { %3449 = vmatprep.subr.bf16.mxu1 %v3911_v0 }
 0x99b   : > { %3450 = vmatpush3.bf16.msra.mxu1 %v3656_v39 }
 0x99c   : > { %3451 = vmatprep.subr.bf16.mxu1 %v3911_v0 }
 0x99f   : > { %3452 = vmatpush3.bf16.msra.mxu1 %v3657_v40 }
 0x9a0   : > { %3477 = vmatprep.subr.bf16.mxu1 %v3911_v0 }
 0xa55   : > { %v1935_v11 = vpop.f32.mrb[16].mxu1 }
 0xa56   : > { %v1936_v12 = vadd.f32 %v2967_v10, %v1935_v11  ;;  %v3415_v51 = vpop.f32.mrb[17].mxu1 }
 0xa57   : > { %v1938_v13 = vpop.f32.mrb[18].mxu1  ;;  %v3658_v51 = vld [vmem:[%s4735_s14] sm:$0xff]  }
 0xa58   : > { %v4569_v50 = vadd.f32 %v1936_v12, %v4484_v3  ;;  %v1939_v14 = vadd.f32 %v2967_v10, %v1938_v13  ;;  %v3416_v15 = vpop.f32.mrb[19].mxu1  ;;  %v3659_v13 = vld [vmem:[%s4735_s14 + $0x8] sm:$0xff]  }
 0xa59   : > { %v3661_v15 = vld [vmem:[%s4735_s14 + $0x18] sm:$0xff]  }
 0xa5a   : > { %1944 = vst [vmem:[%s568_s24] sm:$0xff] %v4569_v50  ;;  %v1948_v16 = vand.u32 2147483647, %v4569_v50  ;;  %v4574_v55 = vadd.f32 %v1939_v14, %v4488_v7  ;;  %v1946_v7 = vmax.f32 %v4569_v50, 0.0  ;;  %v3660_v14 = vld [vmem:[%s4735_s14 + $0x10] sm:$0xff]  }
 0xa5c   : > { %v1950_v17 = vsub.f32 0.0, %v1948_v16  ;;  %1945 = vst [vmem:[%s568_s24 + $0x8] sm:$0xff] %v4574_v55  ;;  %v1949_v18 = vand.u32 2147483647, %v4574_v55  ;;  %v1947_v1 = vmax.f32 %v4574_v55, 0.0  ;;  %v3662_v16 = vld [vmem:[%s4735_s14 + $0x20] sm:$0xff]  }
 0xa5e   : > { %v1952_v19 = vmul.f32 1.442695, %v1950_v17  ;;  %v1951_v20 = vsub.f32 0.0, %v1949_v18  ;;  %v3663_v17 = vld [vmem:[%s4735_s14 + $0x28] sm:$0xff]   ;;  %v3664_v18 = vld [vmem:[%s4735_s14 + $0x30] sm:$0xff]  }
 0xa60   : > { %3762 = vpow2.f32 %v1952_v19  ;;  %v1954_v21 = vmul.f32 1.442695, %v1951_v20  ;;  %v3665_v19 = vld [vmem:[%s4735_s14 + $0x38] sm:$0xff]   ;;  %v3022_v20 = vld [vmem:[#allocation4 + $0x4] ss:$0 sm:$0xff] }
 0xa62   : > { %3764 = vpow2.f32 %v1954_v21 }
 0xa6a   : > { %v3763_v3 = vpop.eup %3762 }
 0xa6b   : > { %v1956_v22 = vadd.f32 1.0, %v3763_v3 }
 0xa6c   : > { %v3765_v60 = vpop.eup %3764 }
 0xa6d   : > { %v1957_v23 = vadd.f32 1.0, %v3765_v60  ;;  %3766 = vlog2.f32 %v1956_v22 }
 0xa6f   : > { %3768 = vlog2.f32 %v1957_v23 }
 0xa77   : > { %v3767_v24 = vpop.eup %3766 }
 0xa78   : > { %v1959_v25 = vmul.f32 0.6931472, %v3767_v24 }
 0xa79   : > { %v3769_v26 = vpop.eup %3768 }
 0xa7a   : > { %v1961_v27 = vmul.f32 0.6931472, %v3769_v26  ;;  %v1962_v28 = vadd.f32 %v1959_v25, %v1946_v7 }
 0xa7c   : > { %v1963_v29 = vadd.f32 %v1961_v27, %v1947_v1  ;;  %v2976_v30 = vadd.f32 -0.6931472, %v1962_v28 }
 0xa7e   : > { %v2977_v31 = vadd.f32 -0.6931472, %v1963_v29 }
 0xa80   : > { %v1983_v32 = vpack.c.bf16 %v2977_v31, %v2976_v30 }
 0xa82   : > { %3434 = vmatmul.mubr.bf16.vlgmr.msra.gmra.mrb[20].mxu0 %v1983_v32 }
 0xa83   : > { %3473 = vmatprep.mubr.msk.bf16.mxu0 %vm3912_vm0, %v3911_v0  ;;  %3458 = vmatpush3.bf16.msra.mxu0 %v3658_v51 }
 0xa84   : > { %3459 = vmatprep.subr.bf16.mxu0 %v3911_v0 }
 0xa87   : > { %3460 = vmatpush3.bf16.msra.mxu0 %v3659_v13 }
 0xa88   : > { %3461 = vmatprep.subr.bf16.mxu0 %v3911_v0 }
 0xa8b   : > { %3462 = vmatpush3.bf16.msra.mxu0 %v3660_v14 }
 0xa8c   : > { %3463 = vmatprep.subr.bf16.mxu0 %v3911_v0 }
 0xa8f   : > { %3464 = vmatpush3.bf16.msra.mxu0 %v3661_v15 }
 0xa90   : > { %3465 = vmatprep.subr.bf16.mxu0 %v3911_v0 }
 0xa93   : > { %3466 = vmatpush3.bf16.msra.mxu0 %v3662_v16 }
 0xa94   : > { %3467 = vmatprep.subr.bf16.mxu0 %v3911_v0 }
 0xa97   : > { %3468 = vmatpush3.bf16.msra.mxu0 %v3663_v17 }
 0xa98   : > { %3469 = vmatprep.subr.bf16.mxu0 %v3911_v0 }
 0xa9b   : > { %3470 = vmatpush3.bf16.msra.mxu0 %v3664_v18 }
 0xa9c   : > { %3471 = vmatprep.subr.bf16.mxu0 %v3911_v0 }
 0xa9f   : > { %3472 = vmatpush3.bf16.msra.mxu0 %v3665_v19 }
 0xaa0   : > { %3497 = vmatprep.subr.bf16.mxu0 %v3911_v0 }
 0xb55   : > { %v2074_v42 = vpop.f32.mrb[20].mxu0 }
 0xb56   : > { %v2075_v43 = vadd.f32 %v2995_v41, %v2074_v42  ;;  %v3435_v44 = vpop.f32.mrb[21].mxu0 }
 0xb57   : > { %v2077_v45 = vpop.f32.mrb[22].mxu0  ;;  %v3666_v44 = vld [vmem:[%s4735_s14 + $0x40] sm:$0xff]  }
 0xb58   : > { %v2083_v46 = vand.u32 2147483647, %v2075_v43  ;;  %v2078_v48 = vadd.f32 %v2995_v41, %v2077_v45  ;;  %v3436_v49 = vpop.f32.mrb[23].mxu0  ;;  %v2081_v2 = vmax.f32 %v2075_v43, 0.0  ;;  %v3667_v45 = vld [vmem:[%s4735_s14 + $0x48] sm:$0xff]  }
 0xb59   : > { %v3670_v49 = vld [vmem:[%s4735_s14 + $0x60] sm:$0xff]  }
 0xb5a   : > { %v2085_v52 = vsub.f32 0.0, %v2083_v46  ;;  %v2084_v53 = vand.u32 2147483647, %v2078_v48  ;;  %v2082_v8 = vmax.f32 %v2078_v48, 0.0  ;;  %v3668_v46 = vld [vmem:[%s4735_s14 + $0x50] sm:$0xff]   ;;  %v3669_v48 = vld [vmem:[%s4735_s14 + $0x58] sm:$0xff]  }
 0xb5c   : > { %v2087_v54 = vmul.f32 1.442695, %v2085_v52  ;;  %v2086_v56 = vsub.f32 0.0, %v2084_v53  ;;  %v3671_v52 = vld [vmem:[%s4735_s14 + $0x68] sm:$0xff]   ;;  %v3672_v53 = vld [vmem:[%s4735_s14 + $0x70] sm:$0xff]  }
 0xb5e   : > { %3770 = vpow2.f32 %v2087_v54  ;;  %v2089_v57 = vmul.f32 1.442695, %v2086_v56  ;;  %v3673_v54 = vld [vmem:[%s4735_s14 + $0x78] sm:$0xff]   ;;  %v3033_v56 = vld [vmem:[%s4736_s21] ss:$0 sm:$0xff] }
 0xb60   : > { %3772 = vpow2.f32 %v2089_v57 }
 0xb68   : > { %v3771_v58 = vpop.eup %3770 }
 0xb69   : > { %v2091_v59 = vadd.f32 1.0, %v3771_v58 }
 0xb6a   : > { %v3773_v61 = vpop.eup %3772 }
 0xb6b   : > { %3774 = vlog2.f32 %v2091_v59  ;;  %v2092_v62 = vadd.f32 1.0, %v3773_v61 }
 0xb6d   : > { %3776 = vlog2.f32 %v2092_v62 }
 0xb75   : > { %v3775_v63 = vpop.eup %3774 }
 0xb76   : > { %v2094_v4 = vmul.f32 0.6931472, %v3775_v63 }
 0xb77   : > { %v3777_v5 = vpop.eup %3776 }
 0xb78   : > { %v2097_v6 = vadd.f32 %v2094_v4, %v2081_v2  ;;  %v2096_v9 = vmul.f32 0.6931472, %v3777_v5 }
 0xb7a   : > { %v2098_v47 = vadd.f32 %v2096_v9, %v2082_v8  ;;  %v3004_v10 = vadd.f32 -0.6931472, %v2097_v6 }
 0xb7c   : > { %v3005_v11 = vadd.f32 -0.6931472, %v2098_v47 }
 0xb7e   : > { %v2118_v12 = vpack.c.bf16 %v3005_v11, %v3004_v10 }
 0xb80   : > { %3454 = vmatmul.mubr.bf16.vlgmr.msra.gmra.mrb[20].mxu1 %v2118_v12 }
 0xb81   : > { %3493 = vmatprep.mubr.msk.bf16.mxu1 %vm3912_vm0, %v3911_v0  ;;  %3478 = vmatpush3.bf16.msra.mxu1 %v3666_v44 }
 0xb82   : > { %3479 = vmatprep.subr.bf16.mxu1 %v3911_v0 }
 0xb85   : > { %3480 = vmatpush3.bf16.msra.mxu1 %v3667_v45 }
 0xb86   : > { %3481 = vmatprep.subr.bf16.mxu1 %v3911_v0 }
 0xb89   : > { %3482 = vmatpush3.bf16.msra.mxu1 %v3668_v46 }
 0xb8a   : > { %3483 = vmatprep.subr.bf16.mxu1 %v3911_v0 }
 0xb8d   : > { %3484 = vmatpush3.bf16.msra.mxu1 %v3669_v48 }
 0xb8e   : > { %3485 = vmatprep.subr.bf16.mxu1 %v3911_v0 }
 0xb91   : > { %3486 = vmatpush3.bf16.msra.mxu1 %v3670_v49 }
 0xb92   : > { %3487 = vmatprep.subr.bf16.mxu1 %v3911_v0 }
 0xb95   : > { %3488 = vmatpush3.bf16.msra.mxu1 %v3671_v52 }
 0xb96   : > { %3489 = vmatprep.subr.bf16.mxu1 %v3911_v0 }
 0xb99   : > { %3490 = vmatpush3.bf16.msra.mxu1 %v3672_v53 }
 0xb9a   : > { %3491 = vmatprep.subr.bf16.mxu1 %v3911_v0 }
 0xb9d   : > { %3492 = vmatpush3.bf16.msra.mxu1 %v3673_v54 }
 0xc53   : > { %v2209_v21 = vpop.f32.mrb[20].mxu1 }
 0xc54   : > { %v2210_v3 = vadd.f32 %v3022_v20, %v2209_v21  ;;  %v3455_v22 = vpop.f32.mrb[21].mxu1 }
 0xc55   : > { %v2212_v60 = vpop.f32.mrb[22].mxu1  ;;  %v3674_v22 = vld [vmem:[#allocation6] sm:$0xff]  }
 0xc56   : > { %v2216_v23 = vadd.f32 %v2210_v3, %v4569_v50  ;;  %v2213_v24 = vadd.f32 %v3022_v20, %v2212_v60  ;;  %v3456_v7 = vpop.f32.mrb[23].mxu1  ;;  %v3675_v60 = vld [vmem:[#allocation6 + $0x8] sm:$0xff]  }
 0xc57   : > { %v3678_v7 = vld [vmem:[#allocation6 + $0x20] sm:$0xff]  }
 0xc58   : > { %v2220_v25 = vand.u32 2147483647, %v2216_v23  ;;  %v2217_v26 = vadd.f32 %v2213_v24, %v4574_v55  ;;  %v2218_v50 = vmax.f32 %v2216_v23, 0.0  ;;  %v3676_v23 = vld [vmem:[#allocation6 + $0x10] sm:$0xff]   ;;  %v3677_v24 = vld [vmem:[#allocation6 + $0x18] sm:$0xff]  }
 0xc5a   : > { %v2222_v1 = vsub.f32 0.0, %v2220_v25  ;;  %v2221_v27 = vand.u32 2147483647, %v2217_v26  ;;  %v2219_v39 = vmax.f32 %v2217_v26, 0.0  ;;  %v3679_v25 = vld [vmem:[#allocation6 + $0x28] sm:$0xff]   ;;  %v3680_v26 = vld [vmem:[#allocation6 + $0x30] sm:$0xff]  }
 0xc5c   : > { %v2224_v28 = vmul.f32 1.442695, %v2222_v1  ;;  %v2223_v29 = vsub.f32 0.0, %v2221_v27  ;;  %v3681_v1 = vld [vmem:[#allocation6 + $0x38] sm:$0xff]  }
 0xc5d   : > { %v3061_v27 = vld [vmem:[%s4736_s21 + $0x1] ss:$0 sm:$0xff] }
 0xc5e   : > { %3778 = vpow2.f32 %v2224_v28  ;;  %v2226_v30 = vmul.f32 1.442695, %v2223_v29 }
 0xc60   : > { %3780 = vpow2.f32 %v2226_v30 }
 0xc68   : > { %v3779_v31 = vpop.eup %3778 }
 0xc69   : > { %v2228_v32 = vadd.f32 1.0, %v3779_v31 }
 0xc6a   : > { %v3781_v33 = vpop.eup %3780 }
 0xc6b   : > { %3782 = vlog2.f32 %v2228_v32  ;;  %v2229_v34 = vadd.f32 1.0, %v3781_v33 }
 0xc6d   : > { %3784 = vlog2.f32 %v2229_v34 }
 0xc75   : > { %v3783_v35 = vpop.eup %3782 }
 0xc76   : > { %v2231_v36 = vmul.f32 0.6931472, %v3783_v35 }
 0xc77   : > { %v3785_v37 = vpop.eup %3784 }
 0xc78   : > { %v2234_v38 = vadd.f32 %v2231_v36, %v2218_v50  ;;  %v2233_v55 = vmul.f32 0.6931472, %v3785_v37 }
 0xc7a   : > { %v2235_v40 = vadd.f32 %v2233_v55, %v2219_v39  ;;  %v3031_v41 = vadd.f32 -0.6931472, %v2234_v38 }
 0xc7c   : > { %v3032_v42 = vadd.f32 -0.6931472, %v2235_v40 }
 0xc7e   : > { %v2254_v43 = vpack.c.bf16 %v3032_v42, %v3031_v41 }
 0xc80   : > { %3474 = vmatmul.mubr.bf16.vlgmr.msra.gmra.mrb[24].mxu0 %v2254_v43 }
 0xc81   : > { %3513 = vmatprep.mubr.msk.bf16.mxu0 %vm3912_vm0, %v3911_v0  ;;  %3498 = vmatpush3.bf16.msra.mxu0 %v3674_v22 }
 0xc82   : > { %3499 = vmatprep.subr.bf16.mxu0 %v3911_v0 }
 0xc85   : > { %3500 = vmatpush3.bf16.msra.mxu0 %v3675_v60 }
 0xc86   : > { %3501 = vmatprep.subr.bf16.mxu0 %v3911_v0 }
 0xc89   : > { %3502 = vmatpush3.bf16.msra.mxu0 %v3676_v23 }
 0xc8a   : > { %3503 = vmatprep.subr.bf16.mxu0 %v3911_v0 }
 0xc8d   : > { %3504 = vmatpush3.bf16.msra.mxu0 %v3677_v24 }
 0xc8e   : > { %3505 = vmatprep.subr.bf16.mxu0 %v3911_v0 }
 0xc91   : > { %3506 = vmatpush3.bf16.msra.mxu0 %v3678_v7 }
 0xc92   : > { %3507 = vmatprep.subr.bf16.mxu0 %v3911_v0 }
 0xc95   : > { %3508 = vmatpush3.bf16.msra.mxu0 %v3679_v25 }
 0xc96   : > { %3509 = vmatprep.subr.bf16.mxu0 %v3911_v0 }
 0xc99   : > { %3510 = vmatpush3.bf16.msra.mxu0 %v3680_v26 }
 0xc9a   : > { %3511 = vmatprep.subr.bf16.mxu0 %v3911_v0 }
 0xc9d   : > { %3512 = vmatpush3.bf16.msra.mxu0 %v3681_v1 }
 0xd53   : > { %v2344_v57 = vpop.f32.mrb[24].mxu0 }
 0xd54   : > { %v2345_v58 = vadd.f32 %v3033_v56, %v2344_v57  ;;  %v3475_v59 = vpop.f32.mrb[25].mxu0 }
 0xd55   : > { %v2347_v61 = vpop.f32.mrb[26].mxu0 }
 0xd56   : > { %v2353_v62 = vand.u32 2147483647, %v2345_v58  ;;  %v2348_v63 = vadd.f32 %v3033_v56, %v2347_v61  ;;  %v3476_v2 = vpop.f32.mrb[27].mxu0  ;;  %v2351_v13 = vmax.f32 %v2345_v58, 0.0 }
 0xd58   : > { %v2355_v4 = vsub.f32 0.0, %v2353_v62  ;;  %v2354_v5 = vand.u32 2147483647, %v2348_v63  ;;  %v2352_v17 = vmax.f32 %v2348_v63, 0.0 }
 0xd5a   : > { %v2357_v6 = vmul.f32 1.442695, %v2355_v4  ;;  %v2356_v8 = vsub.f32 0.0, %v2354_v5 }
 0xd5c   : > { %3786 = vpow2.f32 %v2357_v6  ;;  %v2359_v9 = vmul.f32 1.442695, %v2356_v8 }
 0xd5e   : > { %3788 = vpow2.f32 %v2359_v9 }
 0xd66   : > { %v3787_v47 = vpop.eup %3786 }
 0xd67   : > { %v2361_v10 = vadd.f32 1.0, %v3787_v47 }
 0xd68   : > { %v3789_v11 = vpop.eup %3788 }
 0xd69   : > { %3790 = vlog2.f32 %v2361_v10  ;;  %v2362_v12 = vadd.f32 1.0, %v3789_v11 }
 0xd6b   : > { %3792 = vlog2.f32 %v2362_v12 }
 0xd73   : > { %v3791_v51 = vpop.eup %3790 }
 0xd74   : > { %v2364_v14 = vmul.f32 0.6931472, %v3791_v51 }
 0xd75   : > { %v3793_v15 = vpop.eup %3792 }
 0xd76   : > { %v2367_v16 = vadd.f32 %v2364_v14, %v2351_v13  ;;  %v2366_v18 = vmul.f32 0.6931472, %v3793_v15 }
 0xd78   : > { %v2368_v19 = vadd.f32 %v2366_v18, %v2352_v17  ;;  %v3042_v20 = vadd.f32 -0.6931472, %v2367_v16 }
 0xd7a   : > { %v3043_v21 = vadd.f32 -0.6931472, %v2368_v19 }
 0xd7c   : > { %v2388_v3 = vpack.c.bf16 %v3043_v21, %v3042_v20 }
 0xd7e   : > { %3494 = vmatmul.mubr.bf16.vlgmr.msra.gmra.mrb[24].mxu1 %v2388_v3 }
 0xe51   : > { %v2479_v28 = vpop.f32.mrb[24].mxu1 }
 0xe52   : > { %v2480_v29 = vadd.f32 %v3061_v27, %v2479_v28  ;;  %v3495_v30 = vpop.f32.mrb[25].mxu1 }
 0xe53   : > { %v2482_v31 = vpop.f32.mrb[26].mxu1 }
 0xe54   : > { %v2488_v32 = vand.u32 2147483647, %v2480_v29  ;;  %v2483_v33 = vadd.f32 %v3061_v27, %v2482_v31  ;;  %v3496_v34 = vpop.f32.mrb[27].mxu1  ;;  %v2486_v42 = vmax.f32 %v2480_v29, 0.0 }
 0xe56   : > { %v2490_v35 = vsub.f32 0.0, %v2488_v32  ;;  %v2489_v50 = vand.u32 2147483647, %v2483_v33  ;;  %v2487_v46 = vmax.f32 %v2483_v33, 0.0 }
 0xe58   : > { %v2492_v36 = vmul.f32 1.442695, %v2490_v35  ;;  %v2491_v37 = vsub.f32 0.0, %v2489_v50 }
 0xe5a   : > { %3794 = vpow2.f32 %v2492_v36  ;;  %v2494_v38 = vmul.f32 1.442695, %v2491_v37 }
 0xe5c   : > { %3796 = vpow2.f32 %v2494_v38 }
 0xe64   : > { %v3795_v0 = vpop.eup %3794 }
 0xe65   : > { %v2496_v39 = vadd.f32 1.0, %v3795_v0 }
 0xe66   : > { %v3797_v55 = vpop.eup %3796 }
 0xe67   : > { %3798 = vlog2.f32 %v2496_v39  ;;  %v2497_v40 = vadd.f32 1.0, %v3797_v55 }
 0xe69   : > { %3800 = vlog2.f32 %v2497_v40 }
 0xe71   : > { %v3799_v41 = vpop.eup %3798 }
 0xe72   : > { %v2499_v43 = vmul.f32 0.6931472, %v3799_v41 }
 0xe73   : > { %v3801_v44 = vpop.eup %3800 }
 0xe74   : > { %v2502_v45 = vadd.f32 %v2499_v43, %v2486_v42  ;;  %v2501_v48 = vmul.f32 0.6931472, %v3801_v44 }
 0xe76   : > { %v2503_v49 = vadd.f32 %v2501_v48, %v2487_v46  ;;  %v3070_v52 = vadd.f32 -0.6931472, %v2502_v45 }
 0xe78   : > { %v3071_v53 = vadd.f32 -0.6931472, %v2503_v49 }
 0xe7a   : > { %v2522_v54 = vpack.c.bf16 %v3071_v53, %v3070_v52 }
 0xe7c   : > { %3514 = vmatmul.mubr.bf16.vlgmr.msra.gmra.mrb[28].mxu0 %v2522_v54 }
 0xf4f   : > { %v2605_v56 = vpop.f32.mrb[28].mxu0 }
 0xf50   : > { %2612 = vst [vmem:[%s574_s30] sm:$0xff] %v2605_v56  ;;  %v3515_v57 = vpop.f32.mrb[29].mxu0 }
 0xf51   : > { %v2608_v58 = vpop.f32.mrb[30].mxu0 }
 0xf52   : > { %2613 = vst [vmem:[%s574_s30 + $0x8] sm:$0xff] %v2608_v58  ;;  %v3516_v59 = vpop.f32.mrb[31].mxu0 }
 0xf53 PF: > { %s28_s18 = sadd.s32 1, %s3902_s18  }
 0xf54   : > { %p25_p2 = scmp.ge.s32.totalorder %s28_s18, 4  }
 0xf56   :  { %27 = sbr.rel (!%p25_p2) target bundleno = 7 (0x7), region = 152 }
 0xf5d   :  { %2653 = vsyncpa [#allocation3], 1 }
 0xf5e   :  { %2655 = vsyncpa [#allocation3 + $0x1], 1 }
 0xf5f   :  { %2656 = vsyncpa [#allocation5], 1 }

</bundles_post_ra>
